<compile_context>
chip_gen: v7x
topology: tpu7x:2x2x1
jax: 0.10.0
libtpu: 0.0.40
codegen_flags: <defaults>
</compile_context>

<pallas_src>
import functools
import math

import jax
import jax.numpy as jnp
from jax import lax
from jax.experimental import pallas as pl
from jax.experimental.pallas import tpu as pltpu

# MXU-native dtype on v6e/v7x (f32 accumulation is kept everywhere).  Set to jnp.float32 for
# bit-exact parity with an f32 PyTorch reference.
_MXU_DTYPE = jnp.bfloat16


# ----------------------------------------------------------------------------
# In-kernel LayerNorm (torch-reference semantics: unbiased std, eps added to std)
# ----------------------------------------------------------------------------
def _layer_norm(s, a, b, eps):
    d = s.shape[-1]
    mean = jnp.mean(s, axis=-1, keepdims=True)
    var = jnp.sum((s - mean) ** 2, axis=-1, keepdims=True) * (1.0 / (d - 1))
    inv = 1.0 / (jnp.sqrt(var) + eps)                     # one reciprocal per row
    return (s - mean) * (a * inv) + b


# ----------------------------------------------------------------------------
# Fully fused EncoderLayer kernel (one batch element per grid step)
# ----------------------------------------------------------------------------
def _encoder_layer_kernel(
    x_ref, m_ref,
    w_qkv_ref, b_qkv_ref, wo_ref, bo_ref,
    w1_ref, b1_ref, w2_ref, b2_ref,
    ln1_a_ref, ln1_b_ref, ln2_a_ref, ln2_b_ref,
    o_ref,
    *, h, d_model, eps, scale,
):
    dk = d_model // h
    x = x_ref[0].astype(jnp.float32)                      # (L, D)
    add_mask = m_ref[0].astype(jnp.float32)               # (Lm, L) additive (0 keep / -1e9)

    # --- fused Q|K|V projection: one MXU pass over x for all three projections ---
    qkv = jnp.dot(x.astype(_MXU_DTYPE), w_qkv_ref[...].astype(_MXU_DTYPE),
                  preferred_element_type=jnp.float32) + b_qkv_ref[...]     # (L, 3D) f32

    # --- multi-head scaled-dot-product attention (heads unrolled; lane-aligned slices) ---
    heads = []
    for j in range(h):
        qh = qkv[:, j * dk:(j + 1) * dk].astype(_MXU_DTYPE)
        kh = qkv[:, d_model + j * dk:d_model + (j + 1) * dk].astype(_MXU_DTYPE)
        vh = qkv[:, 2 * d_model + j * dk:2 * d_model + (j + 1) * dk].astype(_MXU_DTYPE)
        # q @ k^T via dot_general contracting the last dims (no explicit transpose).
        s = lax.dot_general(qh, kh, (((1,), (1,)), ((), ())),
                            preferred_element_type=jnp.float32) * scale    # (L, L)
        s = s + add_mask                                   # additive mask, broadcast over rows
        s = s - jnp.max(s, axis=-1, keepdims=True)
        p = jnp.exp(s)
        p = p / jnp.sum(p, axis=-1, keepdims=True)         # exact softmax denominator
        heads.append(jnp.dot(p.astype(_MXU_DTYPE), vh,
                             preferred_element_type=jnp.float32))          # (L, dk)
    attn = jnp.concatenate(heads, axis=-1)                 # (L, D) head-concat by layout

    # --- output projection + fused residual-add + LayerNorm (sublayer 0) ---
    attn = jnp.dot(attn.astype(_MXU_DTYPE), wo_ref[...].astype(_MXU_DTYPE),
                   preferred_element_type=jnp.float32) + bo_ref[...]
    x = x + _layer_norm(attn, ln1_a_ref[...], ln1_b_ref[...], eps)

    # --- position-wise feed-forward + fused residual-add + LayerNorm (sublayer 1) ---
    ff = jnp.dot(x.astype(_MXU_DTYPE), w1_ref[...].astype(_MXU_DTYPE),
                 preferred_element_type=jnp.float32) + b1_ref[...]
    ff = jnp.maximum(ff, 0.0)
    ff = jnp.dot(ff.astype(_MXU_DTYPE), w2_ref[...].astype(_MXU_DTYPE),
                 preferred_element_type=jnp.float32) + b2_ref[...]
    y = x + _layer_norm(ff, ln2_a_ref[...], ln2_b_ref[...], eps)

    o_ref[0] = y.astype(o_ref.dtype)


def encoder_layer_forward(params, x, mask, h, eps=1e-6):
    """x: (B, L, D) float32; mask: (B, 1 or L, L) with 1.0 = keep, 0.0 = masked."""
    B, L, D = x.shape
    d_ff = params["w1"].shape[1]
    dk = D // h
    scale = 1.0 / math.sqrt(dk)

    # Additive mask built once outside the kernel (0 keep / -1e9 masked).
    add_mask = (1.0 - mask.astype(jnp.float32)) * jnp.float32(-1e9)
    Lm = add_mask.shape[1]

    kernel = functools.partial(_encoder_layer_kernel, h=h, d_model=D, eps=eps, scale=scale)

    def rep(shape):  # weight / bias / LN param: same block for every grid step (stays resident)
        return pl.BlockSpec(shape, lambda b: (0,) * len(shape))

    return pl.pallas_call(
        kernel,
        out_shape=jax.ShapeDtypeStruct((B, L, D), x.dtype),
        grid=(B,),
        in_specs=[
            pl.BlockSpec((1, L, D), lambda b: (b, 0, 0)),    # x (per batch)
            pl.BlockSpec((1, Lm, L), lambda b: (b, 0, 0)),   # additive mask (per batch)
            rep((D, 3 * D)), rep((1, 3 * D)),                # w_qkv, b_qkv
            rep((D, D)), rep((1, D)),                        # wo, bo
            rep((D, d_ff)), rep((1, d_ff)),                  # w1, b1
            rep((d_ff, D)), rep((1, D)),                     # w2, b2
            rep((1, D)), rep((1, D)),                        # ln1 a, b
            rep((1, D)), rep((1, D)),                        # ln2 a, b
        ],
        out_specs=pl.BlockSpec((1, L, D), lambda b: (b, 0, 0)),
        compiler_params=pltpu.CompilerParams(dimension_semantics=("parallel",)),
    )(
        x, add_mask,
        params["w_qkv"], params["b_qkv"],
        params["wo"], params["bo"],
        params["w1"], params["b1"],
        params["w2"], params["b2"],
        params["ln1_a"], params["ln1_b"],
        params["ln2_a"], params["ln2_b"],
    )


# ----------------------------------------------------------------------------
# Pure-JAX reference (f32 math) for a sanity check of the fused kernel
# ----------------------------------------------------------------------------
def encoder_layer_reference(params, x, mask, h, eps=1e-6):
    B, L, D = x.shape
    dk = D // h
    f32 = lambda t: t.astype(jnp.float32)

    def ln(s, a, b):
        d = s.shape[-1]
        mean = jnp.mean(s, -1, keepdims=True)
        std = jnp.sqrt(jnp.sum((s - mean) ** 2, -1, keepdims=True) / (d - 1))
        return a * (s - mean) / (std + eps) + b

    qkv = jnp.einsum("bld,de->ble", x, f32(params["w_qkv"])) + params["b_qkv"]
    q, k, v = jnp.split(qkv, 3, axis=-1)
    sh = lambda t: t.reshape(B, L, h, dk).transpose(0, 2, 1, 3)          # (B,h,L,dk)
    q, k, v = sh(q), sh(k), sh(v)
    s = jnp.einsum("bhqd,bhkd->bhqk", q, k) / math.sqrt(dk)
    s = jnp.where(mask[:, None, :, :] == 0.0, jnp.float32(-1e9), s)
    p = jax.nn.softmax(s, axis=-1)
    o = jnp.einsum("bhqk,bhkd->bhqd", p, v).transpose(0, 2, 1, 3).reshape(B, L, D)
    attn = jnp.einsum("bld,de->ble", o, f32(params["wo"])) + params["bo"]
    x1 = x + ln(attn, params["ln1_a"], params["ln1_b"])
    ff = jax.nn.relu(jnp.einsum("bld,de->ble", x1, f32(params["w1"])) + params["b1"])
    ff = jnp.einsum("bld,de->ble", ff, f32(params["w2"])) + params["b2"]
    return x1 + ln(ff, params["ln2_a"], params["ln2_b"])


# ----------------------------------------------------------------------------
# Deterministic parameter construction (matmul weights stored in _MXU_DTYPE)
# ----------------------------------------------------------------------------
def init_params(key, d_model, d_ff):
    ks = jax.random.split(key, 6)

    def lin(k, din, dout):
        kw, kb = jax.random.split(k)
        w = jax.random.normal(kw, (din, dout), jnp.float32) / math.sqrt(din)
        b = 0.01 * jax.random.normal(kb, (1, dout), jnp.float32)
        return w, b

    wq, bq = lin(ks[0], d_model, d_model)
    wk, bk = lin(ks[1], d_model, d_model)
    wv, bv = lin(ks[2], d_model, d_model)
    wo, bo = lin(ks[3], d_model, d_model)
    w1, b1 = lin(ks[4], d_model, d_ff)
    w2, b2 = lin(ks[5], d_ff, d_model)
    return {
        "w_qkv": jnp.concatenate([wq, wk, wv], axis=1).astype(_MXU_DTYPE),   # (D, 3D): q|k|v
        "b_qkv": jnp.concatenate([bq, bk, bv], axis=1),                      # (1, 3D) f32
        "wo": wo.astype(_MXU_DTYPE), "bo": bo,
        "w1": w1.astype(_MXU_DTYPE), "b1": b1,
        "w2": w2.astype(_MXU_DTYPE), "b2": b2,
        "ln1_a": jnp.ones((1, d_model), jnp.float32),
        "ln1_b": jnp.zeros((1, d_model), jnp.float32),
        "ln2_a": jnp.ones((1, d_model), jnp.float32),
        "ln2_b": jnp.zeros((1, d_model), jnp.float32),
    }


# ----------------------------------------------------------------------------
# Main
# ----------------------------------------------------------------------------
if __name__ == "__main__":
    D, H, D_FF = 256, 2, 512          # dk = D // H = 128 -> lane-aligned head slices
    B, L = 2, 16

    key = jax.random.PRNGKey(0)
    kp, kx = jax.random.split(key)
    params = init_params(kp, D, D_FF)

    x = jax.random.normal(kx, (B, L, D), jnp.float32)
    lengths = jnp.array([L, L - 4], jnp.int32)            # simple padding mask for batch 1
    mask = (jnp.arange(L)[None, :] < lengths[:, None]).astype(jnp.float32)[:, None, :]  # (B,1,L)

    fwd = jax.jit(functools.partial(encoder_layer_forward, h=H))
    out = jax.block_until_ready(fwd(params, x, mask))

    assert out.shape == (B, L, D) and out.dtype == jnp.float32
    assert bool(jnp.all(jnp.isfinite(out)))

    # Loose sanity check vs. pure-JAX f32 reference (bf16 MXU noise << 0.5).
    ref = encoder_layer_reference(params, x, mask, H)
    err = float(jnp.max(jnp.abs(out - ref)))
    assert err < 0.5, f"max abs err {err}"

    print("KERNEL_OK")
</pallas_src>

<mosaic_0001>
module attributes {stable_mosaic.version = 11 : i64} {
  func.func @_encoder_layer_kernel(%arg0: i32, %arg1: memref<1x16x256xf32, #tpu.memory_space<vmem>>, %arg2: memref<1x1x16xf32, #tpu.memory_space<vmem>>, %arg3: memref<256x768xbf16, #tpu.memory_space<vmem>>, %arg4: memref<1x768xf32, #tpu.memory_space<vmem>>, %arg5: memref<256x256xbf16, #tpu.memory_space<vmem>>, %arg6: memref<1x256xf32, #tpu.memory_space<vmem>>, %arg7: memref<256x512xbf16, #tpu.memory_space<vmem>>, %arg8: memref<1x512xf32, #tpu.memory_space<vmem>>, %arg9: memref<512x256xbf16, #tpu.memory_space<vmem>>, %arg10: memref<1x256xf32, #tpu.memory_space<vmem>>, %arg11: memref<1x256xf32, #tpu.memory_space<vmem>>, %arg12: memref<1x256xf32, #tpu.memory_space<vmem>>, %arg13: memref<1x256xf32, #tpu.memory_space<vmem>>, %arg14: memref<1x256xf32, #tpu.memory_space<vmem>>, %arg15: memref<1x16x256xf32, #tpu.memory_space<vmem>>) attributes {dimension_semantics = [#tpu.dimension_semantics<parallel>], iteration_bounds = array<i64: 2>, scalar_prefetch = 0 : i64, scratch_operands = 0 : i64, tpu.core_type = #tpu.core_type<tc>, window_params = [{transform_indices = @transform_0, window_bounds = array<i64: 1, 16, 256>}, {transform_indices = @transform_1, window_bounds = array<i64: 1, 1, 16>}, {pipeline_mode = #tpu.pipeline_mode<synchronous>, transform_indices = @transform_2, window_bounds = array<i64: 256, 768>}, {pipeline_mode = #tpu.pipeline_mode<synchronous>, transform_indices = @transform_3, window_bounds = array<i64: 1, 768>}, {pipeline_mode = #tpu.pipeline_mode<synchronous>, transform_indices = @transform_4, window_bounds = array<i64: 256, 256>}, {pipeline_mode = #tpu.pipeline_mode<synchronous>, transform_indices = @transform_5, window_bounds = array<i64: 1, 256>}, {pipeline_mode = #tpu.pipeline_mode<synchronous>, transform_indices = @transform_6, window_bounds = array<i64: 256, 512>}, {pipeline_mode = #tpu.pipeline_mode<synchronous>, transform_indices = @transform_7, window_bounds = array<i64: 1, 512>}, {pipeline_mode = #tpu.pipeline_mode<synchronous>, transform_indices = @transform_8, window_bounds = array<i64: 512, 256>}, {pipeline_mode = #tpu.pipeline_mode<synchronous>, transform_indices = @transform_9, window_bounds = array<i64: 1, 256>}, {pipeline_mode = #tpu.pipeline_mode<synchronous>, transform_indices = @transform_10, window_bounds = array<i64: 1, 256>}, {pipeline_mode = #tpu.pipeline_mode<synchronous>, transform_indices = @transform_11, window_bounds = array<i64: 1, 256>}, {pipeline_mode = #tpu.pipeline_mode<synchronous>, transform_indices = @transform_12, window_bounds = array<i64: 1, 256>}, {pipeline_mode = #tpu.pipeline_mode<synchronous>, transform_indices = @transform_13, window_bounds = array<i64: 1, 256>}, {transform_indices = @transform_14, window_bounds = array<i64: 1, 16, 256>}]} {
    %c0 = arith.constant 0 : index
    %c0_0 = arith.constant 0 : index
    %c0_1 = arith.constant 0 : index
    %0 = vector.load %arg1[%c0, %c0_0, %c0_1] : memref<1x16x256xf32, #tpu.memory_space<vmem>>, vector<1x16x256xf32>
    %1 = vector.shape_cast %0 : vector<1x16x256xf32> to vector<16x256xf32>
    %c0_2 = arith.constant 0 : index
    %c0_3 = arith.constant 0 : index
    %c0_4 = arith.constant 0 : index
    %2 = vector.load %arg2[%c0_2, %c0_3, %c0_4] : memref<1x1x16xf32, #tpu.memory_space<vmem>>, vector<1x1x16xf32>
    %3 = vector.shape_cast %2 : vector<1x1x16xf32> to vector<1x16xf32>
    %4 = arith.truncf %1 : vector<16x256xf32> to vector<16x256xbf16>
    %c0_5 = arith.constant 0 : index
    %c0_6 = arith.constant 0 : index
    %5 = vector.load %arg3[%c0_5, %c0_6] : memref<256x768xbf16, #tpu.memory_space<vmem>>, vector<256x768xbf16>
    %cst = arith.constant dense<0.000000e+00> : vector<16x768xf32>
    %6 = tpu.matmul %4, %5, %cst {dimension_numbers = #tpu.dot_dimension_numbers<[1], [0], [0], [1], [0, 0, 1, 1], [], []>} : vector<16x256xbf16>, vector<256x768xbf16>, vector<16x768xf32> -> vector<16x768xf32>
    %c0_7 = arith.constant 0 : index
    %c0_8 = arith.constant 0 : index
    %7 = vector.load %arg4[%c0_7, %c0_8] : memref<1x768xf32, #tpu.memory_space<vmem>>, vector<1x768xf32>
    %8 = vector.broadcast %7 : vector<1x768xf32> to vector<16x768xf32>
    %9 = arith.addf %6, %8 : vector<16x768xf32>
    %10 = vector.extract_strided_slice %9 {offsets = [0, 0], sizes = [16, 128], strides = [1, 1]} : vector<16x768xf32> to vector<16x128xf32>
    %11 = arith.truncf %10 : vector<16x128xf32> to vector<16x128xbf16>
    %12 = vector.extract_strided_slice %9 {offsets = [0, 256], sizes = [16, 128], strides = [1, 1]} : vector<16x768xf32> to vector<16x128xf32>
    %13 = arith.truncf %12 : vector<16x128xf32> to vector<16x128xbf16>
    %14 = vector.extract_strided_slice %9 {offsets = [0, 512], sizes = [16, 128], strides = [1, 1]} : vector<16x768xf32> to vector<16x128xf32>
    %15 = arith.truncf %14 : vector<16x128xf32> to vector<16x128xbf16>
    %cst_9 = arith.constant dense<0.000000e+00> : vector<16x16xf32>
    %16 = tpu.matmul %11, %13, %cst_9 {dimension_numbers = #tpu.dot_dimension_numbers<[1], [1], [0], [0], [0, 0, 1, 0], [], []>} : vector<16x128xbf16>, vector<16x128xbf16>, vector<16x16xf32> -> vector<16x16xf32>
    %cst_10 = arith.constant 0.0883883461 : f32
    %17 = vector.broadcast %cst_10 : f32 to vector<16x16xf32>
    %18 = arith.mulf %16, %17 : vector<16x16xf32>
    %19 = vector.broadcast %3 : vector<1x16xf32> to vector<16x16xf32>
    %20 = arith.addf %18, %19 : vector<16x16xf32>
    %cst_11 = arith.constant dense<0xFF800000> : vector<16xf32>
    %21 = vector.multi_reduction <maximumf>, %20, %cst_11 [1] : vector<16x16xf32> to vector<16xf32>
    %22 = vector.shape_cast %21 : vector<16xf32> to vector<16x1xf32>
    %23 = vector.broadcast %22 : vector<16x1xf32> to vector<16x16xf32>
    %24 = arith.subf %20, %23 : vector<16x16xf32>
    %25 = math.exp %24 : vector<16x16xf32>
    %cst_12 = arith.constant dense<0.000000e+00> : vector<16xf32>
    %26 = vector.multi_reduction <add>, %25, %cst_12 [1] : vector<16x16xf32> to vector<16xf32>
    %27 = vector.shape_cast %26 : vector<16xf32> to vector<16x1xf32>
    %28 = vector.broadcast %27 : vector<16x1xf32> to vector<16x16xf32>
    %29 = arith.divf %25, %28 : vector<16x16xf32>
    %30 = arith.truncf %29 : vector<16x16xf32> to vector<16x16xbf16>
    %cst_13 = arith.constant dense<0.000000e+00> : vector<16x128xf32>
    %31 = tpu.matmul %30, %15, %cst_13 {dimension_numbers = #tpu.dot_dimension_numbers<[1], [0], [0], [1], [0, 0, 1, 1], [], []>} : vector<16x16xbf16>, vector<16x128xbf16>, vector<16x128xf32> -> vector<16x128xf32>
    %32 = vector.extract_strided_slice %9 {offsets = [0, 128], sizes = [16, 128], strides = [1, 1]} : vector<16x768xf32> to vector<16x128xf32>
    %33 = arith.truncf %32 : vector<16x128xf32> to vector<16x128xbf16>
    %34 = vector.extract_strided_slice %9 {offsets = [0, 384], sizes = [16, 128], strides = [1, 1]} : vector<16x768xf32> to vector<16x128xf32>
    %35 = arith.truncf %34 : vector<16x128xf32> to vector<16x128xbf16>
    %36 = vector.extract_strided_slice %9 {offsets = [0, 640], sizes = [16, 128], strides = [1, 1]} : vector<16x768xf32> to vector<16x128xf32>
    %37 = arith.truncf %36 : vector<16x128xf32> to vector<16x128xbf16>
    %cst_14 = arith.constant dense<0.000000e+00> : vector<16x16xf32>
    %38 = tpu.matmul %33, %35, %cst_14 {dimension_numbers = #tpu.dot_dimension_numbers<[1], [1], [0], [0], [0, 0, 1, 0], [], []>} : vector<16x128xbf16>, vector<16x128xbf16>, vector<16x16xf32> -> vector<16x16xf32>
    %cst_15 = arith.constant 0.0883883461 : f32
    %39 = vector.broadcast %cst_15 : f32 to vector<16x16xf32>
    %40 = arith.mulf %38, %39 : vector<16x16xf32>
    %41 = vector.broadcast %3 : vector<1x16xf32> to vector<16x16xf32>
    %42 = arith.addf %40, %41 : vector<16x16xf32>
    %cst_16 = arith.constant dense<0xFF800000> : vector<16xf32>
    %43 = vector.multi_reduction <maximumf>, %42, %cst_16 [1] : vector<16x16xf32> to vector<16xf32>
    %44 = vector.shape_cast %43 : vector<16xf32> to vector<16x1xf32>
    %45 = vector.broadcast %44 : vector<16x1xf32> to vector<16x16xf32>
    %46 = arith.subf %42, %45 : vector<16x16xf32>
    %47 = math.exp %46 : vector<16x16xf32>
    %cst_17 = arith.constant dense<0.000000e+00> : vector<16xf32>
    %48 = vector.multi_reduction <add>, %47, %cst_17 [1] : vector<16x16xf32> to vector<16xf32>
    %49 = vector.shape_cast %48 : vector<16xf32> to vector<16x1xf32>
    %50 = vector.broadcast %49 : vector<16x1xf32> to vector<16x16xf32>
    %51 = arith.divf %47, %50 : vector<16x16xf32>
    %52 = arith.truncf %51 : vector<16x16xf32> to vector<16x16xbf16>
    %cst_18 = arith.constant dense<0.000000e+00> : vector<16x128xf32>
    %53 = tpu.matmul %52, %37, %cst_18 {dimension_numbers = #tpu.dot_dimension_numbers<[1], [0], [0], [1], [0, 0, 1, 1], [], []>} : vector<16x16xbf16>, vector<16x128xbf16>, vector<16x128xf32> -> vector<16x128xf32>
    %54 = tpu.concatenate %31, %53 in 1 : vector<16x128xf32>, vector<16x128xf32> -> vector<16x256xf32>
    %55 = arith.truncf %54 : vector<16x256xf32> to vector<16x256xbf16>
    %c0_19 = arith.constant 0 : index
    %c0_20 = arith.constant 0 : index
    %56 = vector.load %arg5[%c0_19, %c0_20] : memref<256x256xbf16, #tpu.memory_space<vmem>>, vector<256x256xbf16>
    %cst_21 = arith.constant dense<0.000000e+00> : vector<16x256xf32>
    %57 = tpu.matmul %55, %56, %cst_21 {dimension_numbers = #tpu.dot_dimension_numbers<[1], [0], [0], [1], [0, 0, 1, 1], [], []>} : vector<16x256xbf16>, vector<256x256xbf16>, vector<16x256xf32> -> vector<16x256xf32>
    %c0_22 = arith.constant 0 : index
    %c0_23 = arith.constant 0 : index
    %58 = vector.load %arg6[%c0_22, %c0_23] : memref<1x256xf32, #tpu.memory_space<vmem>>, vector<1x256xf32>
    %59 = vector.broadcast %58 : vector<1x256xf32> to vector<16x256xf32>
    %60 = arith.addf %57, %59 : vector<16x256xf32>
    %c0_24 = arith.constant 0 : index
    %c0_25 = arith.constant 0 : index
    %61 = vector.load %arg11[%c0_24, %c0_25] : memref<1x256xf32, #tpu.memory_space<vmem>>, vector<1x256xf32>
    %c0_26 = arith.constant 0 : index
    %c0_27 = arith.constant 0 : index
    %62 = vector.load %arg12[%c0_26, %c0_27] : memref<1x256xf32, #tpu.memory_space<vmem>>, vector<1x256xf32>
    %cst_28 = arith.constant dense<0.000000e+00> : vector<16xf32>
    %63 = vector.multi_reduction <add>, %60, %cst_28 [1] : vector<16x256xf32> to vector<16xf32>
    %64 = vector.shape_cast %63 : vector<16xf32> to vector<16x1xf32>
    %cst_29 = arith.constant 2.560000e+02 : f32
    %65 = vector.broadcast %cst_29 : f32 to vector<16x1xf32>
    %66 = arith.divf %64, %65 : vector<16x1xf32>
    %67 = vector.broadcast %66 : vector<16x1xf32> to vector<16x256xf32>
    %68 = arith.subf %60, %67 : vector<16x256xf32>
    %69 = arith.mulf %68, %68 : vector<16x256xf32>
    %cst_30 = arith.constant dense<0.000000e+00> : vector<16xf32>
    %70 = vector.multi_reduction <add>, %69, %cst_30 [1] : vector<16x256xf32> to vector<16xf32>
    %71 = vector.shape_cast %70 : vector<16xf32> to vector<16x1xf32>
    %cst_31 = arith.constant 0.00392156886 : f32
    %72 = vector.broadcast %cst_31 : f32 to vector<16x1xf32>
    %73 = arith.mulf %71, %72 : vector<16x1xf32>
    %74 = math.sqrt %73 : vector<16x1xf32>
    %cst_32 = arith.constant 9.99999997E-7 : f32
    %75 = vector.broadcast %cst_32 : f32 to vector<16x1xf32>
    %76 = arith.addf %74, %75 : vector<16x1xf32>
    %cst_33 = arith.constant 1.000000e+00 : f32
    %77 = vector.broadcast %cst_33 : f32 to vector<16x1xf32>
    %78 = arith.divf %77, %76 : vector<16x1xf32>
    %79 = vector.broadcast %66 : vector<16x1xf32> to vector<16x256xf32>
    %80 = arith.subf %60, %79 : vector<16x256xf32>
    %81 = vector.broadcast %61 : vector<1x256xf32> to vector<16x256xf32>
    %82 = vector.broadcast %78 : vector<16x1xf32> to vector<16x256xf32>
    %83 = arith.mulf %81, %82 : vector<16x256xf32>
    %84 = arith.mulf %80, %83 : vector<16x256xf32>
    %85 = vector.broadcast %62 : vector<1x256xf32> to vector<16x256xf32>
    %86 = arith.addf %84, %85 : vector<16x256xf32>
    %87 = arith.addf %1, %86 : vector<16x256xf32>
    %88 = arith.truncf %87 : vector<16x256xf32> to vector<16x256xbf16>
    %c0_34 = arith.constant 0 : index
    %c0_35 = arith.constant 0 : index
    %89 = vector.load %arg7[%c0_34, %c0_35] : memref<256x512xbf16, #tpu.memory_space<vmem>>, vector<256x512xbf16>
    %cst_36 = arith.constant dense<0.000000e+00> : vector<16x512xf32>
    %90 = tpu.matmul %88, %89, %cst_36 {dimension_numbers = #tpu.dot_dimension_numbers<[1], [0], [0], [1], [0, 0, 1, 1], [], []>} : vector<16x256xbf16>, vector<256x512xbf16>, vector<16x512xf32> -> vector<16x512xf32>
    %c0_37 = arith.constant 0 : index
    %c0_38 = arith.constant 0 : index
    %91 = vector.load %arg8[%c0_37, %c0_38] : memref<1x512xf32, #tpu.memory_space<vmem>>, vector<1x512xf32>
    %92 = vector.broadcast %91 : vector<1x512xf32> to vector<16x512xf32>
    %93 = arith.addf %90, %92 : vector<16x512xf32>
    %cst_39 = arith.constant 0.000000e+00 : f32
    %94 = vector.broadcast %cst_39 : f32 to vector<16x512xf32>
    %95 = arith.maximumf %93, %94 : vector<16x512xf32>
    %96 = arith.truncf %95 : vector<16x512xf32> to vector<16x512xbf16>
    %c0_40 = arith.constant 0 : index
    %c0_41 = arith.constant 0 : index
    %97 = vector.load %arg9[%c0_40, %c0_41] : memref<512x256xbf16, #tpu.memory_space<vmem>>, vector<512x256xbf16>
    %cst_42 = arith.constant dense<0.000000e+00> : vector<16x256xf32>
    %98 = tpu.matmul %96, %97, %cst_42 {dimension_numbers = #tpu.dot_dimension_numbers<[1], [0], [0], [1], [0, 0, 1, 1], [], []>} : vector<16x512xbf16>, vector<512x256xbf16>, vector<16x256xf32> -> vector<16x256xf32>
    %c0_43 = arith.constant 0 : index
    %c0_44 = arith.constant 0 : index
    %99 = vector.load %arg10[%c0_43, %c0_44] : memref<1x256xf32, #tpu.memory_space<vmem>>, vector<1x256xf32>
    %100 = vector.broadcast %99 : vector<1x256xf32> to vector<16x256xf32>
    %101 = arith.addf %98, %100 : vector<16x256xf32>
    %c0_45 = arith.constant 0 : index
    %c0_46 = arith.constant 0 : index
    %102 = vector.load %arg13[%c0_45, %c0_46] : memref<1x256xf32, #tpu.memory_space<vmem>>, vector<1x256xf32>
    %c0_47 = arith.constant 0 : index
    %c0_48 = arith.constant 0 : index
    %103 = vector.load %arg14[%c0_47, %c0_48] : memref<1x256xf32, #tpu.memory_space<vmem>>, vector<1x256xf32>
    %cst_49 = arith.constant dense<0.000000e+00> : vector<16xf32>
    %104 = vector.multi_reduction <add>, %101, %cst_49 [1] : vector<16x256xf32> to vector<16xf32>
    %105 = vector.shape_cast %104 : vector<16xf32> to vector<16x1xf32>
    %cst_50 = arith.constant 2.560000e+02 : f32
    %106 = vector.broadcast %cst_50 : f32 to vector<16x1xf32>
    %107 = arith.divf %105, %106 : vector<16x1xf32>
    %108 = vector.broadcast %107 : vector<16x1xf32> to vector<16x256xf32>
    %109 = arith.subf %101, %108 : vector<16x256xf32>
    %110 = arith.mulf %109, %109 : vector<16x256xf32>
    %cst_51 = arith.constant dense<0.000000e+00> : vector<16xf32>
    %111 = vector.multi_reduction <add>, %110, %cst_51 [1] : vector<16x256xf32> to vector<16xf32>
    %112 = vector.shape_cast %111 : vector<16xf32> to vector<16x1xf32>
    %cst_52 = arith.constant 0.00392156886 : f32
    %113 = vector.broadcast %cst_52 : f32 to vector<16x1xf32>
    %114 = arith.mulf %112, %113 : vector<16x1xf32>
    %115 = math.sqrt %114 : vector<16x1xf32>
    %cst_53 = arith.constant 9.99999997E-7 : f32
    %116 = vector.broadcast %cst_53 : f32 to vector<16x1xf32>
    %117 = arith.addf %115, %116 : vector<16x1xf32>
    %cst_54 = arith.constant 1.000000e+00 : f32
    %118 = vector.broadcast %cst_54 : f32 to vector<16x1xf32>
    %119 = arith.divf %118, %117 : vector<16x1xf32>
    %120 = vector.broadcast %107 : vector<16x1xf32> to vector<16x256xf32>
    %121 = arith.subf %101, %120 : vector<16x256xf32>
    %122 = vector.broadcast %102 : vector<1x256xf32> to vector<16x256xf32>
    %123 = vector.broadcast %119 : vector<16x1xf32> to vector<16x256xf32>
    %124 = arith.mulf %122, %123 : vector<16x256xf32>
    %125 = arith.mulf %121, %124 : vector<16x256xf32>
    %126 = vector.broadcast %103 : vector<1x256xf32> to vector<16x256xf32>
    %127 = arith.addf %125, %126 : vector<16x256xf32>
    %128 = arith.addf %87, %127 : vector<16x256xf32>
    %c0_55 = arith.constant 0 : index
    %c0_56 = arith.constant 0 : index
    %c0_57 = arith.constant 0 : index
    %129 = vector.load %arg15[%c0_55, %c0_56, %c0_57] : memref<1x16x256xf32, #tpu.memory_space<vmem>>, vector<1x16x256xf32>
    %130 = vector.shape_cast %129 : vector<1x16x256xf32> to vector<16x256xf32>
    %131 = vector.shape_cast %128 : vector<16x256xf32> to vector<1x16x256xf32>
    tpu.vector_store %arg15[%c0_55, %c0_56, %c0_57], %131 {strides = array<i32>} : memref<1x16x256xf32, #tpu.memory_space<vmem>>, vector<1x16x256xf32>,
    return
  }
  func.func @transform_0(%arg0: i32) -> (i32, i32, i32) {
    %c0_i32 = arith.constant 0 : i32
    %c0_i32_0 = arith.constant 0 : i32
    %c0_i32_1 = arith.constant 0 : i32
    return %arg0, %c0_i32, %c0_i32_0 : i32, i32, i32
  }
  func.func @transform_1(%arg0: i32) -> (i32, i32, i32) {
    %c0_i32 = arith.constant 0 : i32
    %c0_i32_0 = arith.constant 0 : i32
    %c0_i32_1 = arith.constant 0 : i32
    return %arg0, %c0_i32, %c0_i32_0 : i32, i32, i32
  }
  func.func @transform_2(%arg0: i32) -> (i32, i32) {
    %c0_i32 = arith.constant 0 : i32
    %c0_i32_0 = arith.constant 0 : i32
    %c0_i32_1 = arith.constant 0 : i32
    return %c0_i32, %c0_i32_0 : i32, i32
  }
  func.func @transform_3(%arg0: i32) -> (i32, i32) {
    %c0_i32 = arith.constant 0 : i32
    %c0_i32_0 = arith.constant 0 : i32
    %c0_i32_1 = arith.constant 0 : i32
    return %c0_i32, %c0_i32_0 : i32, i32
  }
  func.func @transform_4(%arg0: i32) -> (i32, i32) {
    %c0_i32 = arith.constant 0 : i32
    %c0_i32_0 = arith.constant 0 : i32
    %c0_i32_1 = arith.constant 0 : i32
    return %c0_i32, %c0_i32_0 : i32, i32
  }
  func.func @transform_5(%arg0: i32) -> (i32, i32) {
    %c0_i32 = arith.constant 0 : i32
    %c0_i32_0 = arith.constant 0 : i32
    %c0_i32_1 = arith.constant 0 : i32
    return %c0_i32, %c0_i32_0 : i32, i32
  }
  func.func @transform_6(%arg0: i32) -> (i32, i32) {
    %c0_i32 = arith.constant 0 : i32
    %c0_i32_0 = arith.constant 0 : i32
    %c0_i32_1 = arith.constant 0 : i32
    return %c0_i32, %c0_i32_0 : i32, i32
  }
  func.func @transform_7(%arg0: i32) -> (i32, i32) {
    %c0_i32 = arith.constant 0 : i32
    %c0_i32_0 = arith.constant 0 : i32
    %c0_i32_1 = arith.constant 0 : i32
    return %c0_i32, %c0_i32_0 : i32, i32
  }
  func.func @transform_8(%arg0: i32) -> (i32, i32) {
    %c0_i32 = arith.constant 0 : i32
    %c0_i32_0 = arith.constant 0 : i32
    %c0_i32_1 = arith.constant 0 : i32
    return %c0_i32, %c0_i32_0 : i32, i32
  }
  func.func @transform_9(%arg0: i32) -> (i32, i32) {
    %c0_i32 = arith.constant 0 : i32
    %c0_i32_0 = arith.constant 0 : i32
    %c0_i32_1 = arith.constant 0 : i32
    return %c0_i32, %c0_i32_0 : i32, i32
  }
  func.func @transform_10(%arg0: i32) -> (i32, i32) {
    %c0_i32 = arith.constant 0 : i32
    %c0_i32_0 = arith.constant 0 : i32
    %c0_i32_1 = arith.constant 0 : i32
    return %c0_i32, %c0_i32_0 : i32, i32
  }
  func.func @transform_11(%arg0: i32) -> (i32, i32) {
    %c0_i32 = arith.constant 0 : i32
    %c0_i32_0 = arith.constant 0 : i32
    %c0_i32_1 = arith.constant 0 : i32
    return %c0_i32, %c0_i32_0 : i32, i32
  }
  func.func @transform_12(%arg0: i32) -> (i32, i32) {
    %c0_i32 = arith.constant 0 : i32
    %c0_i32_0 = arith.constant 0 : i32
    %c0_i32_1 = arith.constant 0 : i32
    return %c0_i32, %c0_i32_0 : i32, i32
  }
  func.func @transform_13(%arg0: i32) -> (i32, i32) {
    %c0_i32 = arith.constant 0 : i32
    %c0_i32_0 = arith.constant 0 : i32
    %c0_i32_1 = arith.constant 0 : i32
    return %c0_i32, %c0_i32_0 : i32, i32
  }
  func.func @transform_14(%arg0: i32) -> (i32, i32, i32) {
    %c0_i32 = arith.constant 0 : i32
    %c0_i32_0 = arith.constant 0 : i32
    %c0_i32_1 = arith.constant 0 : i32
    return %arg0, %c0_i32, %c0_i32_0 : i32, i32, i32
  }
}

</mosaic_0001>

<bundles_post_ra>
// kernel: encoder_layer_forward.1
= control target key start
LH: loop header
LB: loop body
LE: loop exit
PB: predicated region body
PF: predicated region fallthrough
CT: control target
= control target key end

     0   :  { %s4738_s0 = inlined_call_operand.hbm [shape: f32[2,16,256], index: 0, kind: input, shape index: {}]   ;;  %s4739_s1 = inlined_call_operand.vmem [shape: f32[2,1,16], index: 1, kind: input, shape index: {}]   ;;  %s4740_s2 = inlined_call_operand.hbm [shape: bf16[256,768], index: 2, kind: input, shape index: {}]   ;;  %s4741_s3 = inlined_call_operand.vmem [shape: f32[1,768], index: 3, kind: input, shape index: {}]   ;;  %s4742_s4 = inlined_call_operand.hbm [shape: bf16[256,256], index: 4, kind: input, shape index: {}]   ;;  %s4743_s5 = inlined_call_operand.vmem [shape: f32[1,256], index: 5, kind: input, shape index: {}]   ;;  %s4744_s6 = inlined_call_operand.hbm [shape: bf16[256,512], index: 6, kind: input, shape index: {}]   ;;  %s4745_s7 = inlined_call_operand.vmem [shape: f32[1,512], index: 7, kind: input, shape index: {}]   ;;  %s4746_s8 = inlined_call_operand.hbm [shape: bf16[512,256], index: 8, kind: input, shape index: {}]   ;;  %s4747_s9 = inlined_call_operand.hbm [shape: f32[1,256], index: 9, kind: input, shape index: {}]   ;;  %s4748_s10 = inlined_call_operand.vmem [shape: f32[1,256], index: 10, kind: input, shape index: {}]   ;;  %s4749_s11 = inlined_call_operand.vmem [shape: f32[1,256], index: 11, kind: input, shape index: {}]   ;;  %s4750_s12 = inlined_call_operand.vmem [shape: f32[1,256], index: 12, kind: input, shape index: {}]   ;;  %s4751_s13 = inlined_call_operand.vmem [shape: f32[1,256], index: 13, kind: input, shape index: {}]   ;;  %s4752_s14 = inlined_call_operand.hbm [shape: f32[2,16,256], index: 14, kind: output, shape index: {}]  }
   0x1   :  { %4759 = sst [smem:[#allocation19_spill]] %s4740_s2 }
   0x2   :  { %4760 = sst [smem:[#allocation20_spill]] %s4744_s6 }
   0x3   :  { %4761 = sst [smem:[#allocation21_spill]] %s4745_s7 }
   0x4   :  { %4762 = sst [smem:[#allocation22_spill]] %s4748_s10 }
   0x5   :  { %4763 = sst [smem:[#allocation23_spill]] %s4749_s11 }
   0x6   :  { %4764 = sst [smem:[#allocation24_spill]] %s4750_s12 }
   0x7   :  { %4765 = sst [smem:[#allocation25_spill]] %s4751_s13 }
   0x8   :  { %4766 = sst [smem:[#allocation26_spill]] %s4752_s14 }
   0x9   :  { %19 = vsyncpa [#allocation3], 0 }
   0xa   :  { %21 = vsyncpa [#allocation3 + $0x1], 0 }
   0xb   :  { %22 = vsyncpa [#allocation6], 0 }
   0xc   :  { %23 = vsyncpa [#allocation9], 0 }
   0xd   :  { %24 = vsyncpa [#allocation12], 0 }
   0xe   :  { %25 = vsyncpa [#allocation4], 0 }
   0xf   :  { %27 = vsyncpa [#allocation4 + $0x1], 0  ;;  %s4301_s29 = smov 0   ;;  %s4303_s30 = smov 0  }
  0x10   :  { %s4305_s15 = smov 0   ;;  %s4307_s16 = smov 0  }
  0x11 LB: > { %s4209_s17 = smov [#allocation5]   ;;  %s4322_s19 = sadd.s32 4294967295, %s4207_s16   ;;  %s4207_s16 = sphi %s4307_s16, %s4798_s16   ;;  %s4203_s15 = sphi %s4305_s15, %s4797_s15   ;;  %s4199_s30 = sphi %s4303_s30, %s4796_s30   ;;  %s4195_s29 = sphi %s4301_s29, %s4795_s29  }
  0x12   : > { %s380_s18 = sshll.u32 %s4209_s17, 4  ;;  %p3108_p0 = scmp.ge.s32.totalorder %s4207_s16, 1  ;;  %s4327_s18 = int_to_ptr.vmem [resolvable:$true] %s380_s18 }
  0x13   : > { %p4754_p1 = scmp.eq.s32.totalorder %s4322_s19, 0  ;;  %p368_p2 = scmp.lt.s32.totalorder %s4207_s16, 3 }
  0x14   : > { %s4210_s21 = smov [#allocation8]   ;;  %s4211_s24 = smov [#allocation7]  }
  0x15   : > { %p4329_p3 = pnand %p3108_p0, %p368_p2  ;;  %s412_s22 = sshll.u32 %s4210_s21, 4  ;;  %s4342_s22 = int_to_ptr.vmem [resolvable:$true] %s412_s22 }
  0x16   : > { %s4344_s25 = sshll.u32 %s4211_s24, 4  ;;  %s4769_s2 = sld [smem:[#allocation19_spill]]  ;;  %s397_s25 = int_to_ptr.vmem [resolvable:$true] %s4344_s25 }
  0x17   : > { %s4767_s20 = scalar_select %p4329_p3, 1, 0 }
  0x18   : > { %p3456_p5 = pneg %p4329_p3 }
  0x1a   : > { %p4338_p6 = pnand %p3456_p5, %p4754_p1 }
  0x1c   : > { %s3959_s28 = scalar_lea.hbm %s4769_s2, 12288  ;;  %p4354_p8 = pneg %p4338_p6 }
  0x1d   : > { %p3960_p7 = scmp.ne.s32.totalorder %s4769_s2, %s3959_s28  ;;  %p3966_p11 = scmp.lt.u32.totalorder %s3959_s28, %s4769_s2 }
  0x1f   : > { %p3962_p9 = pnand %p4354_p8, %p3960_p7 }
  0x21   : > { %p3963_p10 = pneg %p3962_p9 }
  0x23   : > { %p3968_p12 = pnand %p3966_p11, %p3963_p10 }
  0x25   : > { %3971 = shalt.err (!%p3968_p12)
}
  0x26   : > { %s3972_s14 = scalar_lea.vmem %s4327_s18, 12288  ;;  %p3980_p5 = scmp.lt.s32.totalorder %s4327_s18, %s4327_s18 }
  0x27   : > { %p3973_p13 = scmp.ne.s32.totalorder %s4327_s18, %s3972_s14  ;;  %p3981_p4 = scmp.lt.s32.totalorder %s3972_s14, %s3972_s14 }
  0x29   : > { %p3975_p0 = pnand %p3973_p13, %p4354_p8  ;;  %p3982_p7 = por %p3981_p4, %p3980_p5 }
  0x2b   : > { %p3976_p2 = pneg %p3975_p0 }
  0x2d   : > { %p3983_p9 = pnand %p3982_p7, %p3976_p2 }
  0x2f   : > { %3986 = shalt.err (!%p3983_p9)
}
  0x30   : > { %s4212_s26 = smov 384   ;;  %s4213_s13 = smov 24  }
  0x31   : > { %3459 = dma.hbm_to_vmem [thread:$0]  (!%p4338_p6), %s4769_s2, 12288, %s4327_s18, [#allocation6], %s4212_s26, %s4212_s26, %s4213_s13  }
  0x32   : > { %s4771_s6 = sld [smem:[#allocation20_spill]] }
  0x38   : > { %s3987_s12 = scalar_lea.hbm %s4771_s6, 8192 }
  0x39   : > { %p3988_p4 = scmp.ne.s32.totalorder %s4771_s6, %s3987_s12  ;;  %p3994_p12 = scmp.lt.u32.totalorder %s3987_s12, %s4771_s6 }
  0x3b   : > { %p3990_p10 = pnand %p3988_p4, %p4354_p8 }
  0x3d   : > { %p3991_p11 = pneg %p3990_p10 }
  0x3f   : > { %p3996_p13 = pnand %p3994_p12, %p3991_p11 }
  0x41   : > { %3999 = shalt.err (!%p3996_p13)
}
  0x42   : > { %s4000_s18 = scalar_lea.vmem %s4342_s22, 8192  ;;  %p4008_p7 = scmp.lt.s32.totalorder %s4342_s22, %s4342_s22 }
  0x43   : > { %p4001_p0 = scmp.ne.s32.totalorder %s4342_s22, %s4000_s18  ;;  %p4009_p9 = scmp.lt.s32.totalorder %s4000_s18, %s4000_s18 }
  0x45   : > { %p4003_p2 = pnand %p4001_p0, %p4354_p8  ;;  %p4010_p4 = por %p4009_p9, %p4008_p7 }
  0x47   : > { %p4004_p5 = pneg %p4003_p2 }
  0x49   : > { %p4011_p10 = pnand %p4010_p4, %p4004_p5 }
  0x4b   : > { %4014 = shalt.err (!%p4011_p10)
}
  0x4c   : > { %s4756_s7 = smov 256   ;;  %s4757_s10 = smov 16  }
  0x4d   : > { %3465 = dma.hbm_to_vmem [thread:$0]  (!%p4338_p6), %s4771_s6, 8192, %s4342_s22, [#allocation9], %s4756_s7, %s4756_s7, %s4757_s10  }
  0x4e   : > { %s4015_s27 = scalar_lea.hbm %s4742_s4, 4096 }
  0x4f   : > { %p4016_p11 = scmp.ne.s32.totalorder %s4742_s4, %s4015_s27  ;;  %p4022_p0 = scmp.lt.u32.totalorder %s4015_s27, %s4742_s4 }
  0x51   : > { %p4018_p12 = pnand %p4016_p11, %p4354_p8 }
  0x53   : > { %p4019_p13 = pneg %p4018_p12 }
  0x55   : > { %p4024_p2 = pnand %p4022_p0, %p4019_p13 }
  0x57   : > { %4027 = shalt.err (!%p4024_p2)
}
  0x58   : > { %s4028_s18 = scalar_lea.vmem %s397_s25, 4096  ;;  %p4036_p4 = scmp.lt.s32.totalorder %s397_s25, %s397_s25 }
  0x59   : > { %p4029_p5 = scmp.ne.s32.totalorder %s397_s25, %s4028_s18  ;;  %p4037_p10 = scmp.lt.s32.totalorder %s4028_s18, %s4028_s18 }
  0x5b   : > { %p4031_p7 = pnand %p4029_p5, %p4354_p8  ;;  %p4038_p1 = por %p4037_p10, %p4036_p4 }
  0x5d   : > { %p4032_p9 = pneg %p4031_p7 }
  0x5f   : > { %p4039_p3 = pnand %p4038_p1, %p4032_p9 }
  0x61   : > { %4042 = shalt.err (!%p4039_p3)
}
  0x62   : > { %s4216_s22 = smov 128   ;;  %s4217_s11 = smov 8  }
  0x63   : > { %3462 = dma.hbm_to_vmem [thread:$0]  (!%p4338_p6), %s4742_s4, 4096, %s397_s25, [#allocation6], %s4216_s22, %s4216_s22, %s4217_s11  }
  0x64   : > { %s4218_s13 = smov [#allocation10]   ;;  %s4219_s28 = smov [#allocation11]  }
  0x65   : > { %s428_s27 = sshll.u32 %s4218_s13, 4  ;;  %s442_s17 = sshll.u32 %s4219_s28, 4  ;;  %s429_s27 = int_to_ptr.vmem [resolvable:$true] %s428_s27  ;;  %s443_s17 = int_to_ptr.vmem [resolvable:$true] %s442_s17 }
  0x66   : > { %s4043_s18 = scalar_lea.hbm %s4746_s8, 8192 }
  0x67   : > { %p4044_p1 = scmp.ne.s32.totalorder %s4746_s8, %s4043_s18  ;;  %p4050_p12 = scmp.lt.u32.totalorder %s4043_s18, %s4746_s8 }
  0x69   : > { %p4046_p3 = pnand %p4044_p1, %p4354_p8 }
  0x6b   : > { %p4047_p11 = pneg %p4046_p3 }
  0x6d   : > { %p4052_p13 = pnand %p4050_p12, %p4047_p11 }
  0x6f   : > { %4055 = shalt.err (!%p4052_p13)
}
  0x70   : > { %s4056_s25 = scalar_lea.vmem %s429_s27, 8192  ;;  %p4064_p7 = scmp.lt.s32.totalorder %s429_s27, %s429_s27 }
  0x71   : > { %p4057_p0 = scmp.ne.s32.totalorder %s429_s27, %s4056_s25  ;;  %p4065_p9 = scmp.lt.s32.totalorder %s4056_s25, %s4056_s25 }
  0x73   : > { %p4059_p2 = pnand %p4057_p0, %p4354_p8  ;;  %p4066_p4 = por %p4065_p9, %p4064_p7 }
  0x75   : > { %p4060_p5 = pneg %p4059_p2 }
  0x77   : > { %p4067_p10 = pnand %p4066_p4, %p4060_p5 }
  0x79   : > { %4070 = shalt.err (!%p4067_p10)
}
  0x7a   : > { %3468 = dma.hbm_to_vmem [thread:$0]  (!%p4338_p6), %s4746_s8, 8192, %s429_s27, [#allocation9], %s4216_s22, %s4216_s22, %s4217_s11  }
  0x7b   : > { %s4071_s12 = scalar_lea.hbm %s4747_s9, 32 }
  0x7c   : > { %p4072_p1 = scmp.ne.s32.totalorder %s4747_s9, %s4071_s12  ;;  %p4078_p12 = scmp.lt.u32.totalorder %s4071_s12, %s4747_s9 }
  0x7e   : > { %p4074_p3 = pnand %p4072_p1, %p4354_p8 }
  0x80   : > { %p4075_p11 = pneg %p4074_p3 }
  0x82   : > { %p4080_p13 = pnand %p4078_p12, %p4075_p11 }
  0x84   : > { %4083 = shalt.err (!%p4080_p13)
}
  0x85   : > { %s4084_s14 = scalar_lea.vmem %s443_s17, 32  ;;  %p4092_p7 = scmp.lt.s32.totalorder %s443_s17, %s443_s17 }
  0x86   : > { %p4085_p0 = scmp.ne.s32.totalorder %s443_s17, %s4084_s14  ;;  %p4093_p9 = scmp.lt.s32.totalorder %s4084_s14, %s4084_s14 }
  0x88   : > { %p4087_p2 = pnand %p4085_p0, %p4354_p8  ;;  %p4094_p4 = por %p4093_p9, %p4092_p7 }
  0x8a   : > { %p4088_p5 = pneg %p4087_p2 }
  0x8c   : > { %p4095_p10 = pnand %p4094_p4, %p4088_p5 }
  0x8e   : > { %4098 = shalt.err (!%p4095_p10)
}
  0x8f   : > { %3471 = dma.hbm_to_vmem [thread:$0]  (!%p4338_p6), %s4747_s9, 32, %s443_s17, [#allocation12]  }
  0x90   : > { %s3107_s21 = sadd.s32 4294967294, %s4207_s16   ;;  %s4458_s23 = sadd.s32 1, %s4207_s16  }
  0x91   : > { %s40_s27 = sadd.s32 1, %s4203_s15  ;;  %s37_s18 = ssub.s32 %s4207_s16, %s4458_s23 }
  0x92   : > { %p47_p8 = scmp.ne.s32.totalorder %s4203_s15, %s4199_s30  ;;  %p38_p1 = scmp.eq.s32.totalorder %s37_s18, 0 }
  0x93   : > { %p48_p3 = scmp.eq.s32.totalorder %s4207_s16, 0  ;;  %p53_p11 = scmp.ne.s32.totalorder %s4199_s30, %s4195_s29 }
  0x94   : > { %p355_p12 = scmp.eq.s32.totalorder %s4322_s19, 1  ;;  %p4772_p0 = scmp.eq.s32.totalorder %s4322_s19, 0 }
  0x95   : > { %s4470_s25 = scalar_select %p38_p1, %s4203_s15, %s40_s27  }
  0x96   : > { %p49_p13 = por %p48_p3, %p47_p8  ;;  %p4474_p2 = por %p4772_p0, %p53_p11 }
  0x97   : > { %p4478_p6 = por %p355_p12, %p47_p8  ;;  %p361_p5 = scmp.eq.s32.totalorder %s3107_s21, 1 }
  0x98   : > { %p3485_p7 = scmp.lt.s32.totalorder %s4207_s16, 2  ;;  %s465_s10 = sand.u32 1, %s4203_s15  }
  0x99   : > { %s4774_s17 = scalar_select %p4478_p6, 1, 0 }
  0x9a   : > { %p4484_p9 = por %p361_p5, %p53_p11  ;;  %s3115_s6 = sshll.u32 %s465_s10, 5 }
  0x9b   : > { %s3390_s12 = sshll.u32 %s4207_s16, 9  ;;  %s469_s24 = scalar_lea.vmem [#allocation2], %s3115_s6 }
  0x9c   : > { %s4775_s2 = scalar_select %p4484_p9, 1, 0 }
  0x9d   : > { %s4492_s28 = scalar_lea.hbm %s4738_s0, %s3390_s12  ;;  %s476_s14 = sshll.u32 %s469_s24, 4  ;;  %s4498_s14 = int_to_ptr.vmem [resolvable:$true] %s476_s14 }
  0x9e   : > { %p4494_p4 = pnand %p3485_p7, %p49_p13  ;;  %s4500_s11 = scalar_lea.sflag [#allocation3], %s465_s10 }
  0x9f   : > { %s4099_s21 = scalar_lea.hbm %s4492_s28, 512  ;;  %s4104_s6 = scalar_lea.hbm %s4738_s0, 1024 }
  0xa0   : > { %p4100_p10 = scmp.ne.s32.totalorder %s4492_s28, %s4099_s21  ;;  %p4101_p8 = pneg %p4494_p4 }
  0xa1   : > { %p4105_p11 = scmp.lt.u32.totalorder %s4492_s28, %s4738_s0  ;;  %p4106_p12 = scmp.lt.u32.totalorder %s4104_s6, %s4099_s21 }
  0xa2   : > { %p4102_p1 = pnand %p4101_p8, %p4100_p10  ;;  %p4108_p0 = scmp.lt.u32.totalorder %s4099_s21, %s4492_s28 }
  0xa3   : > { %p4107_p13 = por %p4106_p12, %p4105_p11 }
  0xa4   : > { %p4103_p3 = pneg %p4102_p1 }
  0xa5   : > { %p4109_p5 = por %p4108_p0, %p4107_p13 }
  0xa7   : > { %p4110_p7 = pnand %p4109_p5, %p4103_p3 }
  0xa9   : > { %4113 = shalt.err (!%p4110_p7)
}
  0xaa   : > { %s4114_s10 = scalar_lea.vmem %s4498_s14, 512  ;;  %s4220_s13 = smov [#allocation2]  }
  0xab   : > { %p4115_p10 = scmp.ne.s32.totalorder %s4498_s14, %s4114_s10  ;;  %s4119_s24 = sshll.u32 %s4220_s13, 4  ;;  %s4120_s24 = int_to_ptr.vmem [resolvable:$false] %s4119_s24 }
  0xac   : > { %s4121_s27 = scalar_lea.vmem %s4120_s24, 1024  ;;  %p4122_p6 = scmp.lt.s32.totalorder %s4498_s14, %s4120_s24 }
  0xad   : > { %p4117_p1 = pnand %p4115_p10, %p4101_p8  ;;  %p4123_p11 = scmp.lt.s32.totalorder %s4121_s27, %s4114_s10 }
  0xaf   : > { %p4118_p9 = pneg %p4117_p1  ;;  %p4124_p12 = por %p4123_p11, %p4122_p6 }
  0xb1   : > { %p4125_p13 = pnand %p4124_p12, %p4118_p9 }
  0xb3   : > { %4128 = shalt.err (!%p4125_p13)
}
  0xb4   : > { %s4777_s21 = smov 16   ;;  %s4778_s18 = smov 256  }
  0xb5   : > { %3475 = dma.hbm_to_vmem [thread:$0]  (!%p4494_p4), %s4492_s28, 512, %s4498_s14, %s4500_s11, %s4778_s18, %s4778_s18, %s4777_s21  }
  0xb6   : > { %p4779_p8 = scmp.ne.s32.totalorder %s4767_s20, 0 }
  0xb7   : > { %s4534_s6 = sand.u32 (!%p4779_p8), 1, %s4199_s30  }
  0xb8   : > { %494 = sbr.rel (%p4779_p8) target bundleno = 2715 (0xa9b), region = 76  ;;  %s3119_s12 = sshll.u32 (!%p4779_p8), %s4534_s6, 5 }
  0xb9   : > { %s497_s26 = scalar_lea.sflag (!%p4779_p8), [#allocation3], %s4534_s6  ;;  %s4540_s22 = scalar_lea.vmem (!%p4779_p8), [#allocation2], %s3119_s12 }
  0xbf   : > { %4174 = dma.done.wait (%p4474_p2), %s497_s26, 512  }
  0xc0   : > { %4176 = vsyncadd (%p4474_p2), %s497_s26, 4294966784  ;;  %p4780_p6 = scmp.eq.s32.totalorder %s4322_s19, 0 }
  0xc2   : > { %4178 = dma.done.wait (%p4780_p6), [#allocation6], 16384   ;;  %p4781_p9 = pmov %p4780_p6 }
  0xc3   : > { %p4782_p4 = pmov %p4780_p6 }
  0xc4   : > { %4180 = vsyncadd (%p4781_p9), [#allocation6], 4294950912 }
  0xc5   : > { %4182 = dma.done.wait (%p4782_p4), [#allocation9], 16384   ;;  %p4783_p3 = pmov %p4782_p4 }
  0xc7   : > { %4184 = vsyncadd (%p4783_p3), [#allocation9], 4294950912  ;;  %p4784_p0 = pmov %p4783_p3 }
  0xc9   : > { %4186 = dma.done.wait (%p4784_p0), [#allocation12], 32   ;;  %p4785_p5 = pmov %p4784_p0 }
  0xca   : > { %v3539_v0 = vld [vmem:[#allocation5 + $0x4] ss:$24 sps:$4 sm:$0xff]   ;;  %v3541_v1 = vld [vmem:[#allocation5] ss:$24 sps:$4 sm:$0xff]   ;;  %v3542_v2 = vld [vmem:[#allocation5 + $0x34] ss:$24 sps:$4 sm:$0xff]  }
  0xcb   : > { %4188 = vsyncadd (%p4785_p5), [#allocation12], 4294967264  ;;  %1187 = vmatprep.subr.bf16.mxu1 %v3539_v0  ;;  %v3544_v3 = vld [vmem:[#allocation5 + $0x30] ss:$24 sps:$4 sm:$0xff]   ;;  %v3545_v4 = vld [vmem:[#allocation5 + $0x64] ss:$24 sps:$4 sm:$0xff]  }
  0xcc   : > { %1188 = vmatpush1.bf16.msra.mxu1 %v3541_v1  ;;  %v3547_v5 = vld [vmem:[#allocation5 + $0x60] ss:$24 sps:$4 sm:$0xff]   ;;  %v3548_v6 = vld [vmem:[#allocation5 + $0x94] ss:$24 sps:$4 sm:$0xff]   ;;  %v3550_v7 = vld [vmem:[#allocation5 + $0x90] ss:$24 sps:$4 sm:$0xff]  }
  0xcd   : > { %1189 = vmatprep.subr.bf16.mxu1 %v3542_v2  ;;  %v3551_v8 = vld [vmem:[#allocation5 + $0xc4] ss:$24 sps:$4 sm:$0xff]   ;;  %v3553_v9 = vld [vmem:[#allocation5 + $0xc0] ss:$24 sps:$4 sm:$0xff]   ;;  %v3554_v10 = vld [vmem:[#allocation5 + $0xf4] ss:$24 sps:$4 sm:$0xff]  }
  0xce   : > { %v3556_v11 = vld [vmem:[#allocation5 + $0xf0] ss:$24 sps:$4 sm:$0xff]   ;;  %v3557_v12 = vld [vmem:[#allocation5 + $0x124] ss:$24 sps:$4 sm:$0xff]   ;;  %v3559_v16 = vld [vmem:[#allocation5 + $0x120] ss:$24 sps:$4 sm:$0xff]  }
  0xcf   : > { %v573_v13 = vld [vmem:[%s4540_s22 + $0x8] sm:$0xff]  ;;  %v575_v14 = vld [vmem:[%s4540_s22 + $0x18] sm:$0xff]  ;;  %v572_v35 = vld [vmem:[%s4540_s22] sm:$0xff]  ;;  %vm4222_vm0 = vmmov 0   ;;  %p568_p2 = scmp.lt.s32.totalorder %s4322_s19, 1  ;;  %vm1370_vm1 = vcmask 130048  }
  0xd0   : > { %1190 = vmatpush1.bf16.msra.mxu1 %v3544_v3  ;;  %v578_v15 = vpack.c.bf16 %v575_v14, %v573_v13  ;;  %v3560_v17 = vld [vmem:[#allocation5 + $0x154] ss:$24 sps:$4 sm:$0xff]   ;;  %v3562_v18 = vld [vmem:[#allocation5 + $0x150] ss:$24 sps:$4 sm:$0xff]   ;;  %v3563_v19 = vld [vmem:[#allocation5 + $0x184] ss:$24 sps:$4 sm:$0xff]  }
  0xd1   : > { %1191 = vmatprep.subr.bf16.mxu1 %v3545_v4  ;;  %v3565_v20 = vld [vmem:[#allocation5 + $0x180] ss:$24 sps:$4 sm:$0xff]   ;;  %v3566_v21 = vld [vmem:[#allocation5 + $0x1b4] ss:$24 sps:$4 sm:$0xff]   ;;  %v3568_v22 = vld [vmem:[#allocation5 + $0x1b0] ss:$24 sps:$4 sm:$0xff]  }
  0xd2   : > { %1219 = vmatprep.mubr.bf16.mxu1 %v578_v15  ;;  %1305 = vmatprep.mubr.bf16.mxu0 %v578_v15  ;;  %v3569_v23 = vld [vmem:[#allocation5 + $0x1e4] ss:$24 sps:$4 sm:$0xff]   ;;  %v3571_v24 = vld [vmem:[#allocation5 + $0x1e0] ss:$24 sps:$4 sm:$0xff]   ;;  %v3572_v25 = vld [vmem:[#allocation5 + $0x214] ss:$24 sps:$4 sm:$0xff]  }
  0xd3   : > { %v3574_v26 = vld [vmem:[#allocation5 + $0x210] ss:$24 sps:$4 sm:$0xff]   ;;  %v3575_v27 = vld [vmem:[#allocation5 + $0x244] ss:$24 sps:$4 sm:$0xff]   ;;  %v3577_v28 = vld [vmem:[#allocation5 + $0x240] ss:$24 sps:$4 sm:$0xff]  }
  0xd4   : > { %1192 = vmatpush1.bf16.msra.mxu1 %v3547_v5  ;;  %v3578_v29 = vld [vmem:[#allocation5 + $0x274] ss:$24 sps:$4 sm:$0xff]   ;;  %v3580_v30 = vld [vmem:[#allocation5 + $0x270] ss:$24 sps:$4 sm:$0xff]   ;;  %v3581_v31 = vld [vmem:[#allocation5 + $0x2a4] ss:$24 sps:$4 sm:$0xff]  }
  0xd5   : > { %1193 = vmatprep.subr.bf16.mxu1 %v3548_v6  ;;  %v3583_v32 = vld [vmem:[#allocation5 + $0x2a0] ss:$24 sps:$4 sm:$0xff]   ;;  %v3584_v33 = vld [vmem:[#allocation5 + $0x2d4] ss:$24 sps:$4 sm:$0xff]   ;;  %v3586_v34 = vld [vmem:[#allocation5 + $0x2d0] ss:$24 sps:$4 sm:$0xff]  }
  0xd6   : > { %v574_v36 = vld [vmem:[%s4540_s22 + $0x10] sm:$0xff]  ;;  %v3589_v37 = vld [vmem:[#allocation5 + $0xc] ss:$24 sps:$4 sm:$0xff]   ;;  %v3587_v38 = vld [vmem:[#allocation5 + $0x8] ss:$24 sps:$4 sm:$0xff]   ;;  %s569_s28 = scalar_select %p568_p2, %s4322_s19, 1 }
  0xd7   : > { %v4562_v39 = vpack.c.bf16 %v574_v36, %v572_v35  ;;  %v3592_v40 = vld [vmem:[#allocation5 + $0x3c] ss:$24 sps:$4 sm:$0xff]   ;;  %v3590_v41 = vld [vmem:[#allocation5 + $0x38] ss:$24 sps:$4 sm:$0xff]   ;;  %v3595_v42 = vld [vmem:[#allocation5 + $0x6c] ss:$24 sps:$4 sm:$0xff]  }
  0xd8   : > { %1194 = vmatpush1.bf16.msra.mxu1 %v3550_v7  ;;  %v3593_v43 = vld [vmem:[#allocation5 + $0x68] ss:$24 sps:$4 sm:$0xff]   ;;  %v3598_v44 = vld [vmem:[#allocation5 + $0x9c] ss:$24 sps:$4 sm:$0xff]   ;;  %v3596_v45 = vld [vmem:[#allocation5 + $0x98] ss:$24 sps:$4 sm:$0xff]   ;;  %s570_s10 = scalar_lea.vmem %s4739_s1, %s569_s28 }
  0xd9   : > { %1195 = vmatprep.subr.bf16.mxu1 %v3551_v8  ;;  %v3601_v46 = vld [vmem:[#allocation5 + $0xcc] ss:$24 sps:$4 sm:$0xff]   ;;  %v3599_v47 = vld [vmem:[#allocation5 + $0xc8] ss:$24 sps:$4 sm:$0xff]   ;;  %v3604_v48 = vld [vmem:[#allocation5 + $0xfc] ss:$24 sps:$4 sm:$0xff]  }
  0xda   : > { %v3602_v49 = vld [vmem:[#allocation5 + $0xf8] ss:$24 sps:$4 sm:$0xff]   ;;  %v3607_v50 = vld [vmem:[#allocation5 + $0x12c] ss:$24 sps:$4 sm:$0xff]   ;;  %v3605_v51 = vld [vmem:[#allocation5 + $0x128] ss:$24 sps:$4 sm:$0xff]  }
  0xdb   : > { %v3610_v52 = vld [vmem:[#allocation5 + $0x15c] ss:$24 sps:$4 sm:$0xff]   ;;  %v3608_v53 = vld [vmem:[#allocation5 + $0x158] ss:$24 sps:$4 sm:$0xff]   ;;  %v3613_v54 = vld [vmem:[#allocation5 + $0x18c] ss:$24 sps:$4 sm:$0xff]  }
  0xdc   : > { %1196 = vmatpush1.bf16.msra.mxu1 %v3553_v9  ;;  %v3611_v55 = vld [vmem:[#allocation5 + $0x188] ss:$24 sps:$4 sm:$0xff]   ;;  %v3616_v56 = vld [vmem:[#allocation5 + $0x1bc] ss:$24 sps:$4 sm:$0xff]   ;;  %v3614_v57 = vld [vmem:[#allocation5 + $0x1b8] ss:$24 sps:$4 sm:$0xff]  }
  0xdd   : > { %1197 = vmatprep.subr.bf16.mxu1 %v3554_v10  ;;  %v3619_v58 = vld [vmem:[#allocation5 + $0x1ec] ss:$24 sps:$4 sm:$0xff]   ;;  %v3617_v59 = vld [vmem:[#allocation5 + $0x1e8] ss:$24 sps:$4 sm:$0xff]   ;;  %v3622_v60 = vld [vmem:[#allocation5 + $0x21c] ss:$24 sps:$4 sm:$0xff]  }
  0xde   : > { %v3620_v61 = vld [vmem:[#allocation5 + $0x218] ss:$24 sps:$4 sm:$0xff]   ;;  %v3625_v62 = vld [vmem:[#allocation5 + $0x24c] ss:$24 sps:$4 sm:$0xff]   ;;  %v3623_v63 = vld [vmem:[#allocation5 + $0x248] ss:$24 sps:$4 sm:$0xff]  }
  0xdf   : > { %v3628_v0 = vld [vmem:[#allocation5 + $0x27c] ss:$24 sps:$4 sm:$0xff]   ;;  %v3626_v1 = vld [vmem:[#allocation5 + $0x278] ss:$24 sps:$4 sm:$0xff]   ;;  %v3631_v2 = vld [vmem:[#allocation5 + $0x2ac] ss:$24 sps:$4 sm:$0xff]  }
  0xe0   : > { %1198 = vmatpush1.bf16.msra.mxu1 %v3556_v11  ;;  %v3629_v3 = vld [vmem:[#allocation5 + $0x2a8] ss:$24 sps:$4 sm:$0xff]   ;;  %v3634_v4 = vld [vmem:[#allocation5 + $0x2dc] ss:$24 sps:$4 sm:$0xff]   ;;  %v3632_v5 = vld [vmem:[#allocation5 + $0x2d8] ss:$24 sps:$4 sm:$0xff]  }
  0xe1   : > { %1199 = vmatprep.subr.bf16.mxu1 %v3557_v12  ;;  %v3635_v6 = vld [vmem:[#allocation5 + $0x14] ss:$24 sps:$4 sm:$0xff]   ;;  %v3637_v7 = vld [vmem:[#allocation5 + $0x10] ss:$24 sps:$4 sm:$0xff]   ;;  %v3638_v8 = vld [vmem:[#allocation5 + $0x44] ss:$24 sps:$4 sm:$0xff]  }
  0xe2   : > { %1273 = vmatprep.subr.bf16.mxu0 %v3635_v6  ;;  %v3640_v9 = vld [vmem:[#allocation5 + $0x40] ss:$24 sps:$4 sm:$0xff]   ;;  %v3641_v10 = vld [vmem:[#allocation5 + $0x74] ss:$24 sps:$4 sm:$0xff]   ;;  %v3643_v11 = vld [vmem:[#allocation5 + $0x70] ss:$24 sps:$4 sm:$0xff]  }
  0xe3   : > { %1274 = vmatpush1.bf16.msra.mxu0 %v3637_v7  ;;  %v3644_v12 = vld [vmem:[#allocation5 + $0xa4] ss:$24 sps:$4 sm:$0xff]   ;;  %v3646_v13 = vld [vmem:[#allocation5 + $0xa0] ss:$24 sps:$4 sm:$0xff]   ;;  %v3647_v14 = vld [vmem:[#allocation5 + $0xd4] ss:$24 sps:$4 sm:$0xff]  }
  0xe4   : > { %1200 = vmatpush1.bf16.msra.mxu1 %v3559_v16  ;;  %1275 = vmatprep.subr.bf16.mxu0 %v3638_v8  ;;  %v3650_v16 = vld [vmem:[#allocation5 + $0x104] ss:$24 sps:$4 sm:$0xff]   ;;  %v3679_v35 = vld [vmem:[#allocation5 + $0x2b0] ss:$24 sps:$4 sm:$0xff]   ;;  %s4786_s18 = sld [smem:[#allocation22_spill]]  ;;  %s4787_s7 = sld [smem:[#allocation23_spill]] }
  0xe5   : > { %1201 = vmatprep.subr.bf16.mxu1 %v3560_v17  ;;  %v3652_v17 = vld [vmem:[#allocation5 + $0x100] ss:$24 sps:$4 sm:$0xff]   ;;  %v3680_v36 = vld [vmem:[#allocation5 + $0x2e4] ss:$24 sps:$4 sm:$0xff]   ;;  %s4788_s14 = sld [smem:[#allocation21_spill]]  ;;  %s4789_s13 = sld [smem:[#allocation24_spill]] }
  0xe6   : > { %s4790_s21 = sld [smem:[#allocation25_spill]]  ;;  %s567_s26 = scalar_lea.vmem [#allocation13], %s3119_s12 }
  0xe7   : > { %1276 = vmatpush1.bf16.msra.mxu0 %v3640_v9  ;;  %s2977_s20 = sshll.u32 %s567_s26, 4  ;;  %s4791_s28 = sld [smem:[#allocation26_spill]]  ;;  %s4692_s20 = int_to_ptr.vmem [resolvable:$true] %s2977_s20 }
  0xe8   : > { %1202 = vmatpush1.bf16.msra.mxu1 %v3562_v18  ;;  %1277 = vmatprep.subr.bf16.mxu0 %v3641_v10  ;;  %v3653_v18 = vld [vmem:[#allocation5 + $0x134] ss:$24 sps:$4 sm:$0xff]   ;;  %s4129_s12 = scalar_lea.vmem %s4692_s20, 512  ;;  %p4792_p10 = scmp.ne.s32.totalorder %s4774_s17, 0 }
  0xe9   : > { %1203 = vmatprep.subr.bf16.mxu1 %v3563_v19  ;;  %v3655_v19 = vld [vmem:[#allocation5 + $0x130] ss:$24 sps:$4 sm:$0xff]   ;;  %p4130_p7 = scmp.ne.s32.totalorder %s4692_s20, %s4129_s12  ;;  %s4223_s11 = smov [#allocation13]  }
  0xeb   : > { %1278 = vmatpush1.bf16.msra.mxu0 %v3643_v11  ;;  %p4131_p1 = pnand %p4130_p7, %p4792_p10 }
  0xec   : > { %1204 = vmatpush1.bf16.msra.mxu1 %v3565_v20  ;;  %1279 = vmatprep.subr.bf16.mxu0 %v3644_v12  ;;  %v3656_v20 = vld [vmem:[#allocation5 + $0x164] ss:$24 sps:$4 sm:$0xff]  }
  0xed   : > { %1205 = vmatprep.subr.bf16.mxu1 %v3566_v21  ;;  %v3658_v21 = vld [vmem:[#allocation5 + $0x160] ss:$24 sps:$4 sm:$0xff]   ;;  %p4132_p11 = pneg %p4131_p1 }
  0xef   : > { %1280 = vmatpush1.bf16.msra.mxu0 %v3646_v13 }
  0xf0   : > { %1206 = vmatpush1.bf16.msra.mxu1 %v3568_v22  ;;  %1281 = vmatprep.subr.bf16.mxu0 %v3647_v14  ;;  %v3659_v22 = vld [vmem:[#allocation5 + $0x194] ss:$24 sps:$4 sm:$0xff]  }
  0xf1   : > { %1207 = vmatprep.subr.bf16.mxu1 %v3569_v23  ;;  %v3661_v23 = vld [vmem:[#allocation5 + $0x190] ss:$24 sps:$4 sm:$0xff]  }
  0xf4   : > { %1208 = vmatpush1.bf16.msra.mxu1 %v3571_v24  ;;  %v3662_v24 = vld [vmem:[#allocation5 + $0x1c4] ss:$24 sps:$4 sm:$0xff]  }
  0xf5   : > { %1209 = vmatprep.subr.bf16.mxu1 %v3572_v25  ;;  %v3664_v25 = vld [vmem:[#allocation5 + $0x1c0] ss:$24 sps:$4 sm:$0xff]  }
  0xf8   : > { %1210 = vmatpush1.bf16.msra.mxu1 %v3574_v26  ;;  %v3665_v26 = vld [vmem:[#allocation5 + $0x1f4] ss:$24 sps:$4 sm:$0xff]  }
  0xf9   : > { %1211 = vmatprep.subr.bf16.mxu1 %v3575_v27  ;;  %v3667_v27 = vld [vmem:[#allocation5 + $0x1f0] ss:$24 sps:$4 sm:$0xff]  }
  0xfc   : > { %1212 = vmatpush1.bf16.msra.mxu1 %v3577_v28  ;;  %v3668_v28 = vld [vmem:[#allocation5 + $0x224] ss:$24 sps:$4 sm:$0xff]  }
  0xfd   : > { %1213 = vmatprep.subr.bf16.mxu1 %v3578_v29  ;;  %v3670_v29 = vld [vmem:[#allocation5 + $0x220] ss:$24 sps:$4 sm:$0xff]  }
 0x100   : > { %1214 = vmatpush1.bf16.msra.mxu1 %v3580_v30  ;;  %v3671_v30 = vld [vmem:[#allocation5 + $0x254] ss:$24 sps:$4 sm:$0xff]  }
 0x101   : > { %1215 = vmatprep.subr.bf16.mxu1 %v3581_v31  ;;  %v3673_v31 = vld [vmem:[#allocation5 + $0x250] ss:$24 sps:$4 sm:$0xff]  }
 0x104   : > { %1216 = vmatpush1.bf16.msra.mxu1 %v3583_v32  ;;  %v3674_v32 = vld [vmem:[#allocation5 + $0x284] ss:$24 sps:$4 sm:$0xff]  }
 0x105   : > { %1217 = vmatprep.subr.bf16.mxu1 %v3584_v33  ;;  %v3676_v33 = vld [vmem:[#allocation5 + $0x280] ss:$24 sps:$4 sm:$0xff]  }
 0x108   : > { %1218 = vmatpush1.bf16.msra.mxu1 %v3586_v34  ;;  %v3677_v34 = vld [vmem:[#allocation5 + $0x2b4] ss:$24 sps:$4 sm:$0xff]  }
 0x109   : > { %1230 = vmatprep.subr.bf16.mxu1 %v3589_v37  ;;  %v3682_v37 = vld [vmem:[#allocation5 + $0x2e0] ss:$24 sps:$4 sm:$0xff]  }
 0x10b   : > { %1220 = vmatmul.mubr.bf16.vlgmr.msra.gmra.mrb[0].mxu1 %v4562_v39 }
 0x10c   : > { %1231 = vmatpush1.bf16.msra.mxu1 %v3587_v38  ;;  %1262 = vmatprep.mubr.bf16.mxu1 %v578_v15  ;;  %v3649_v15 = vld [vmem:[#allocation5 + $0xd0] ss:$24 sps:$4 sm:$0xff]   ;;  %v4221_v38 = vmov 0.0  }
 0x10d   : > { %1232 = vmatprep.subr.bf16.mxu1 %v3592_v40  ;;  %1282 = vmatpush1.bf16.msra.mxu0 %v3649_v15  ;;  %v677_v40 = vlaneseq }
 0x10e   : > { %1283 = vmatprep.subr.bf16.mxu0 %v3650_v16 }
 0x110   : > { %1233 = vmatpush1.bf16.msra.mxu1 %v3590_v41  ;;  %v4569_v41 = vshrl.u32 %v677_v40, 7 }
 0x111   : > { %1234 = vmatprep.subr.bf16.mxu1 %v3595_v42  ;;  %1284 = vmatpush1.bf16.msra.mxu0 %v3652_v17 }
 0x112   : > { %1285 = vmatprep.subr.bf16.mxu0 %v3653_v18  ;;  %v4572_v42 = vsub.s32 0, %v4569_v41  ;;  %v695_v6 = vsub.s32 4, %v4569_v41  ;;  %v699_v7 = vsub.s32 5, %v4569_v41 }
 0x114   : > { %1235 = vmatpush1.bf16.msra.mxu1 %v3593_v43  ;;  %v675_v43 = vld [vmem:[%s4741_s3] sm:$0x3f] }
 0x115   : > { %1236 = vmatprep.subr.bf16.mxu1 %v3598_v44  ;;  %1286 = vmatpush1.bf16.msra.mxu0 %v3655_v19  ;;  %v680_v44 = vrot.slane %v675_v43, %v4572_v42  ;;  %v696_v8 = vrot.slane %v675_v43, %v695_v6  ;;  %v700_v9 = vrot.slane %v675_v43, %v699_v7 }
 0x116   : > { %1287 = vmatprep.subr.bf16.mxu0 %v3656_v20 }
 0x118   : > { %1237 = vmatpush1.bf16.msra.mxu1 %v3596_v45 }
 0x119   : > { %1238 = vmatprep.subr.bf16.mxu1 %v3601_v46  ;;  %1288 = vmatpush1.bf16.msra.mxu0 %v3658_v21  ;;  %v3222_v21 = vld [vmem:[%s570_s10] ss:$0 sm:$0xff]  ;;  %s4133_s10 = sshll.u32 %s4223_s11, 4  ;;  %s4134_s10 = int_to_ptr.vmem [resolvable:$false] %s4133_s10 }
 0x11a   : > { %1289 = vmatprep.subr.bf16.mxu0 %v3659_v22  ;;  %p4136_p12 = scmp.lt.s32.totalorder %s4692_s20, %s4134_s10 }
 0x11c   : > { %1239 = vmatpush1.bf16.msra.mxu1 %v3599_v47 }
 0x11d   : > { %1240 = vmatprep.subr.bf16.mxu1 %v3604_v48  ;;  %1290 = vmatpush1.bf16.msra.mxu0 %v3661_v23 }
 0x11e   : > { %1291 = vmatprep.subr.bf16.mxu0 %v3662_v24 }
 0x120   : > { %1241 = vmatpush1.bf16.msra.mxu1 %v3602_v49 }
 0x121   : > { %1242 = vmatprep.subr.bf16.mxu1 %v3607_v50  ;;  %1292 = vmatpush1.bf16.msra.mxu0 %v3664_v25 }
 0x122   : > { %1293 = vmatprep.subr.bf16.mxu0 %v3665_v26 }
 0x124   : > { %1243 = vmatpush1.bf16.msra.mxu1 %v3605_v51 }
 0x125   : > { %1244 = vmatprep.subr.bf16.mxu1 %v3610_v52  ;;  %1294 = vmatpush1.bf16.msra.mxu0 %v3667_v27 }
 0x126   : > { %1295 = vmatprep.subr.bf16.mxu0 %v3668_v28 }
 0x128   : > { %1245 = vmatpush1.bf16.msra.mxu1 %v3608_v53 }
 0x129   : > { %1246 = vmatprep.subr.bf16.mxu1 %v3613_v54  ;;  %1296 = vmatpush1.bf16.msra.mxu0 %v3670_v29 }
 0x12a   : > { %1297 = vmatprep.subr.bf16.mxu0 %v3671_v30 }
 0x12c   : > { %1247 = vmatpush1.bf16.msra.mxu1 %v3611_v55 }
 0x12d   : > { %1248 = vmatprep.subr.bf16.mxu1 %v3616_v56  ;;  %1298 = vmatpush1.bf16.msra.mxu0 %v3673_v31  ;;  %v687_v56 = vsub.s32 2, %v4569_v41 }
 0x12e   : > { %1299 = vmatprep.subr.bf16.mxu0 %v3674_v32 }
 0x130   : > { %1249 = vmatpush1.bf16.msra.mxu1 %v3614_v57  ;;  %v691_v57 = vsub.s32 3, %v4569_v41 }
 0x131   : > { %1250 = vmatprep.subr.bf16.mxu1 %v3619_v58  ;;  %1300 = vmatpush1.bf16.msra.mxu0 %v3676_v33  ;;  %v688_v58 = vrot.slane %v675_v43, %v687_v56 }
 0x132   : > { %1301 = vmatprep.subr.bf16.mxu0 %v3677_v34 }
 0x134   : > { %1251 = vmatpush1.bf16.msra.mxu1 %v3617_v59 }
 0x135   : > { %1252 = vmatprep.subr.bf16.mxu1 %v3622_v60  ;;  %1302 = vmatpush1.bf16.msra.mxu0 %v3679_v35  ;;  %v692_v60 = vrot.slane %v675_v43, %v691_v57 }
 0x136   : > { %1303 = vmatprep.subr.bf16.mxu0 %v3680_v36 }
 0x138   : > { %1253 = vmatpush1.bf16.msra.mxu1 %v3620_v61 }
 0x139   : > { %1254 = vmatprep.subr.bf16.mxu1 %v3625_v62  ;;  %1304 = vmatpush1.bf16.msra.mxu0 %v3682_v37 }
 0x13a   : > { %3400 = vmatprep.subr.bf16.mxu0 %v4221_v38 }
 0x13c   : > { %1255 = vmatpush1.bf16.msra.mxu1 %v3623_v63  ;;  %1306 = vmatmul.mubr.bf16.vlgmr.msra.gmra.mrb[0].mxu0 %v4562_v39 }
 0x13d   : > { %1256 = vmatprep.subr.bf16.mxu1 %v3628_v0  ;;  %3402 = vmatprep.mubr.msk.bf16.mxu0 %vm4222_vm0, %v4221_v38 }
 0x140   : > { %1257 = vmatpush1.bf16.msra.mxu1 %v3626_v1 }
 0x141   : > { %1258 = vmatprep.subr.bf16.mxu1 %v3631_v2 }
 0x144   : > { %1259 = vmatpush1.bf16.msra.mxu1 %v3629_v3 }
 0x145   : > { %1260 = vmatprep.subr.bf16.mxu1 %v3634_v4 }
 0x148   : > { %1261 = vmatpush1.bf16.msra.mxu1 %v3632_v5 }
 0x149   : > { %3412 = vmatprep.subr.bf16.mxu1 %v4221_v38 }
 0x14b   : > { %1263 = vmatmul.mubr.bf16.vlgmr.msra.gmra.mrb[4].mxu1 %v4562_v39  ;;  %v4578_v39 = vsub.s32 1, %v4569_v41 }
 0x14c   : > { %3414 = vmatprep.mubr.msk.bf16.mxu1 %vm4222_vm0, %v4221_v38 }
 0x14d   : > { %v684_v46 = vrot.slane %v675_v43, %v4578_v39 }
 0x1de   : > { %v1221_v45 = vpop.f32.mrb[0].mxu1 }
 0x1df   : > { %v1222_v47 = vadd.f32 %v1221_v45, %v680_v44  ;;  %v1223_v48 = vpop.f32.mrb[1].mxu1 }
 0x1e0   : > { %v1225_v49 = vpop.f32.mrb[2].mxu1  ;;  %v1224_v52 = vadd.f32 %v1223_v48, %v684_v46 }
 0x1e1   : > { %v1226_v50 = vadd.f32 %v1225_v49, %v680_v44  ;;  %v1227_v51 = vpop.f32.mrb[3].mxu1 }
 0x1e2   : > { %v1228_v53 = vadd.f32 %v1227_v51, %v684_v46 }
 0x1e3   : > { %v1316_v54 = vpack.c.bf16 %v1226_v50, %v1222_v47 }
 0x1e4   : > { %v1438_v55 = vpack.c.bf16 %v1228_v53, %v1224_v52 }
 0x20f   : > { %v1307_v10 = vpop.f32.mrb[0].mxu0 }
 0x210   : > { %v1308_v11 = vadd.f32 %v1307_v10, %v696_v8  ;;  %v1309_v12 = vpop.f32.mrb[1].mxu0 }
 0x211   : > { %v1310_v13 = vadd.f32 %v1309_v12, %v700_v9  ;;  %v1311_v14 = vpop.f32.mrb[2].mxu0  ;;  %v3683_v12 = vld [vmem:[#allocation7] ss:$8 sps:$4 sm:$0xff]  }
 0x212   : > { %v1312_v15 = vadd.f32 %v1311_v14, %v696_v8  ;;  %v1313_v16 = vpop.f32.mrb[3].mxu0 }
 0x213   : > { %v1314_v17 = vadd.f32 %v1313_v16, %v700_v9 }
 0x214   : > { %v1318_v18 = vpack.c.bf16 %v1312_v15, %v1308_v11  ;;  %v3688_v15 = vld [vmem:[#allocation7 + $0x14] ss:$8 sps:$4 sm:$0xff]  }
 0x215   : > { %v1440_v19 = vpack.c.bf16 %v1314_v17, %v1310_v13 }
 0x21e   : > { %v1264_v59 = vpop.f32.mrb[4].mxu1 }
 0x21f   : > { %v1266_v61 = vpop.f32.mrb[5].mxu1  ;;  %v1265_v63 = vadd.f32 %v1264_v59, %v688_v58 }
 0x220   : > { %v1268_v62 = vpop.f32.mrb[6].mxu1  ;;  %v1267_v2 = vadd.f32 %v1266_v61, %v692_v60 }
 0x221   : > { %v1269_v0 = vadd.f32 %v1268_v62, %v688_v58  ;;  %v1270_v1 = vpop.f32.mrb[7].mxu1 }
 0x222   : > { %v1271_v3 = vadd.f32 %v1270_v1, %v692_v60 }
 0x223   : > { %v1317_v4 = vpack.c.bf16 %v1269_v0, %v1265_v63 }
 0x224   : > { %v1439_v5 = vpack.c.bf16 %v1271_v3, %v1267_v2  ;;  %v3685_v2 = vld [vmem:[#allocation7 + $0x4] ss:$8 sps:$4 sm:$0xff]  }
 0x225   : > { %3401 = vmatpush3.bf16.xpose.msra.mxu0 %v1317_v4 }
 0x226   : > { %3413 = vmatpush3.bf16.xpose.msra.mxu1 %v1439_v5  ;;  %3406 = vmatprep.subr.bf16.mxu0 %v4221_v38 }
 0x227   : > { %3418 = vmatprep.subr.bf16.mxu1 %v4221_v38 }
 0x22c   : > { %3403 = vmatmul.mubr.bf16.vlgmr.msra.gmra.mrb[4].mxu0 %v1316_v54 }
 0x22d   : > { %3415 = vmatmul.mubr.bf16.vlgmr.msra.gmra.mrb[8].mxu1 %v1438_v55  ;;  %3408 = vmatprep.mubr.msk.bf16.mxu0 %vm4222_vm0, %v4221_v38 }
 0x22e   : > { %3420 = vmatprep.mubr.msk.bf16.mxu1 %vm4222_vm0, %v4221_v38  ;;  %3407 = vmatpush3.bf16.msra.mxu0 %v1318_v18 }
 0x22f   : > { %3419 = vmatpush3.bf16.msra.mxu1 %v1440_v19  ;;  %v3686_v19 = vld [vmem:[#allocation7 + $0x10] ss:$8 sps:$4 sm:$0xff]  }
 0x230   : > { %1759 = vmatprep.subr.bf16.mxu1 %v3685_v2 }
 0x2ff   : > { %v1353_v20 = vpop.f32.mrb[4].mxu0 }
 0x300   : > { %v1360_v22 = vmul.f32 0.088388346, %v1353_v20  ;;  %v3404_v23 = vpop.f32.mrb[5].mxu0  ;;  %v1475_v24 = vpop.f32.mrb[8].mxu1  ;;  %v3691_v20 = vld [vmem:[#allocation7 + $0x24] ss:$8 sps:$4 sm:$0xff]  }
 0x301   : > { %v1482_v25 = vmul.f32 0.088388346, %v1475_v24  ;;  %v1356_v26 = vpop.f32.mrb[6].mxu0  ;;  %v3416_v27 = vpop.f32.mrb[9].mxu1  ;;  %v3692_v23 = vld [vmem:[#allocation7 + $0x30] ss:$8 sps:$4 sm:$0xff]  }
 0x302   : > { %v1361_v28 = vmul.f32 0.088388346, %v1356_v26  ;;  %v3405_v29 = vpop.f32.mrb[7].mxu0  ;;  %v1478_v30 = vpop.f32.mrb[10].mxu1  ;;  %v1368_v31 = vadd.f32 %v3222_v21, %v1360_v22  ;;  %v3694_v22 = vld [vmem:[#allocation7 + $0x34] ss:$8 sps:$4 sm:$0xff]  }
 0x303   : > { %v1483_v32 = vmul.f32 0.088388346, %v1478_v30  ;;  %v3417_v33 = vpop.f32.mrb[11].mxu1  ;;  %v1484_v34 = vadd.f32 %v3222_v21, %v1482_v25  ;;  %v3697_v24 = vld [vmem:[#allocation7 + $0x44] ss:$8 sps:$4 sm:$0xff]  }
 0x304   : > { %v1371_v35 = vsel %vm1370_vm1, %v1368_v31, -inf  ;;  %v1369_v36 = vadd.f32 %v3222_v21, %v1361_v28  ;;  %v3695_v25 = vld [vmem:[#allocation7 + $0x40] ss:$8 sps:$4 sm:$0xff]   ;;  %v3700_v26 = vld [vmem:[#allocation7 + $0x54] ss:$8 sps:$4 sm:$0xff]  }
 0x305   : > { %1372 = vmax.xlane.f32.xlu1 %v1371_v35  ;;  %v1486_v37 = vsel %vm1370_vm1, %v1484_v34, -inf  ;;  %v1485_v38 = vadd.f32 %v3222_v21, %v1483_v32  ;;  %v3689_v21 = vld [vmem:[#allocation7 + $0x20] ss:$8 sps:$4 sm:$0xff]   ;;  %v3698_v27 = vld [vmem:[#allocation7 + $0x50] ss:$8 sps:$4 sm:$0xff]  }
 0x306   : > { %1487 = vmax.xlane.f32.xlu0 %v1486_v37  ;;  %v1374_v40 = vsel %vm1370_vm1, %v1369_v36, -inf  ;;  %v3703_v28 = vld [vmem:[#allocation7 + $0x64] ss:$8 sps:$4 sm:$0xff]   ;;  %v3701_v29 = vld [vmem:[#allocation7 + $0x60] ss:$8 sps:$4 sm:$0xff]  }
 0x307   : > { %v1489_v43 = vsel %vm1370_vm1, %v1485_v38, -inf  ;;  %v3706_v30 = vld [vmem:[#allocation7 + $0x74] ss:$8 sps:$4 sm:$0xff]   ;;  %v3709_v32 = vld [vmem:[#allocation7 + $0x84] ss:$8 sps:$4 sm:$0xff]  }
 0x308   : > { %v3707_v33 = vld [vmem:[#allocation7 + $0x80] ss:$8 sps:$4 sm:$0xff]   ;;  %v3710_v35 = vld [vmem:[#allocation7 + $0x90] ss:$8 sps:$4 sm:$0xff]  }
 0x309   : > { %1375 = vmax.xlane.f32.xlu1 %v1374_v40  ;;  %v3713_v37 = vld [vmem:[#allocation7 + $0xa0] ss:$8 sps:$4 sm:$0xff]   ;;  %v3716_v40 = vld [vmem:[#allocation7 + $0xb0] ss:$8 sps:$4 sm:$0xff]  }
 0x30a   : > { %1490 = vmax.xlane.f32.xlu0 %v1489_v43  ;;  %v3721_v43 = vld [vmem:[#allocation7 + $0xc4] ss:$8 sps:$4 sm:$0xff]  }
 0x392   : > { %v1373_v44 = vpop.xlane.xlu1 %1372 }
 0x393   : > { %v1377_v45 = vsub.f32 %v1368_v31, %v1373_v44  ;;  %v1488_v46 = vpop.xlane.xlu0 %1487  ;;  %v3704_v31 = vld [vmem:[#allocation7 + $0x70] ss:$8 sps:$4 sm:$0xff]   ;;  %v3719_v44 = vld [vmem:[#allocation7 + $0xc0] ss:$8 sps:$4 sm:$0xff]  }
 0x394   : > { %v1492_v47 = vsub.f32 %v1484_v34, %v1488_v46  ;;  %v3712_v34 = vld [vmem:[#allocation7 + $0x94] ss:$8 sps:$4 sm:$0xff]   ;;  %v3722_v46 = vld [vmem:[#allocation7 + $0xd0] ss:$8 sps:$4 sm:$0xff]  }
 0x395   : > { %v1379_v48 = vmul.f32 1.442695, %v1377_v45  ;;  %v3724_v45 = vld [vmem:[#allocation7 + $0xd4] ss:$8 sps:$4 sm:$0xff]  }
 0x396   : > { %v1494_v49 = vmul.f32 1.442695, %v1492_v47  ;;  %v1376_v50 = vpop.xlane.xlu1 %1375  ;;  %v3727_v47 = vld [vmem:[#allocation7 + $0xe4] ss:$8 sps:$4 sm:$0xff]  }
 0x397   : > { %v1378_v51 = vsub.f32 %v1369_v36, %v1376_v50  ;;  %v1491_v52 = vpop.xlane.xlu0 %1490  ;;  %v3715_v36 = vld [vmem:[#allocation7 + $0xa4] ss:$8 sps:$4 sm:$0xff]   ;;  %v3728_v50 = vld [vmem:[#allocation7 + $0xf0] ss:$8 sps:$4 sm:$0xff]  }
 0x398   : > { %3923 = vpow2.f32 %v1494_v49  ;;  %v1493_v53 = vsub.f32 %v1485_v38, %v1491_v52  ;;  %v3718_v38 = vld [vmem:[#allocation7 + $0xb4] ss:$8 sps:$4 sm:$0xff]  }
 0x399   : > { %3925 = vpow2.f32 %v1379_v48  ;;  %v1381_v54 = vmul.f32 1.442695, %v1378_v51  ;;  %v3725_v48 = vld [vmem:[#allocation7 + $0xe0] ss:$8 sps:$4 sm:$0xff]   ;;  %v3730_v49 = vld [vmem:[#allocation7 + $0xf4] ss:$8 sps:$4 sm:$0xff]  }
 0x39a   : > { %v1496_v55 = vmul.f32 1.442695, %v1493_v53 }
 0x39c   : > { %3927 = vpow2.f32 %v1496_v55 }
 0x39d   : > { %3929 = vpow2.f32 %v1381_v54 }
 0x3a2   : > { %v3924_v58 = vpop.eup %3923 }
 0x3a3   : > { %v1498_v59 = vsel %vm1370_vm1, %v3924_v58, 0.0  ;;  %v3926_v60 = vpop.eup %3925 }
 0x3a4   : > { %1499 = vadd.xlane.f32.xlu0 %v1498_v59  ;;  %v1383_v62 = vsel %vm1370_vm1, %v3926_v60, 0.0 }
 0x3a6   : > { %v3928_v61 = vpop.eup %3927 }
 0x3a7   : > { %v1501_v63 = vsel %vm1370_vm1, %v3928_v61, 0.0  ;;  %v3930_v0 = vpop.eup %3929 }
 0x3a8   : > { %1384 = vadd.xlane.f32.xlu0 %v1383_v62  ;;  %1502 = vadd.xlane.f32.xlu1 %v1501_v63  ;;  %v1386_v1 = vsel %vm1370_vm1, %v3930_v0, 0.0  ;;  %v1587_v63 = vld [vmem:[%s4743_s5] sm:$0x3] }
 0x3ac   : > { %1387 = vadd.xlane.f32.xlu1 %v1386_v1  ;;  %v1596_v1 = vrot.slane %v1587_v63, %v4578_v39 }
 0x431   : > { %v1500_v3 = vpop.xlane.xlu0 %1499 }
 0x432   : > { %3931 = vrcp.f32 %v1500_v3 }
 0x435   : > { %v1385_v4 = vpop.xlane.xlu0 %1384  ;;  %v1503_v5 = vpop.xlane.xlu1 %1502 }
 0x436   : > { %3933 = vrcp.f32 %v1503_v5 }
 0x437   : > { %3935 = vrcp.f32 %v1385_v4 }
 0x439   : > { %v1388_v6 = vpop.xlane.xlu1 %1387 }
 0x43a   : > { %3937 = vrcp.f32 %v1388_v6 }
 0x43c   : > { %v3932_v7 = vpop.eup %3931 }
 0x43d   : > { %v1505_v10 = vmul.f32 %v3932_v7, %v3924_v58 }
 0x440   : > { %v3934_v8 = vpop.eup %3933 }
 0x441   : > { %v3936_v9 = vpop.eup %3935  ;;  %v1507_v11 = vmul.f32 %v3934_v8, %v3928_v61 }
 0x442   : > { %v1390_v16 = vmul.f32 %v3936_v9, %v3926_v60 }
 0x443   : > { %v1508_v14 = vpack.c.bf16 %v1507_v11, %v1505_v10 }
 0x444   : > { %v3938_v13 = vpop.eup %3937 }
 0x445   : > { %v1392_v17 = vmul.f32 %v3938_v13, %v3930_v0  ;;  %3421 = vmatmul.mubr.msk.bf16.vlgmr.msra.gmra.mrb[12].mxu1 %vm1370_vm1, %v1508_v14  ;;  %v1592_v0 = vrot.slane %v1587_v63, %v4572_v42  ;;  %v3733_v13 = vld [vmem:[#allocation8 + $0x4] ss:$16 sps:$4 sm:$0xff]   ;;  %v3734_v14 = vld [vmem:[#allocation8 + $0x8] ss:$16 sps:$4 sm:$0xff]  }
 0x446   : > { %1760 = vmatpush1.bf16.msra.mxu1 %v3683_v12  ;;  %v3731_v12 = vld [vmem:[#allocation8] ss:$16 sps:$4 sm:$0xff]   ;;  %2295 = vmatprep.subr.bf16.mxu0 %v3733_v13  ;;  %v3781_v63 = vld [vmem:[#allocation8 + $0x104] ss:$16 sps:$4 sm:$0xff]   ;;  %v3800_v13 = vld [vmem:[#allocation8 + $0x168] ss:$16 sps:$4 sm:$0xff]  }
 0x447   : > { %v1393_v18 = vpack.c.bf16 %v1392_v17, %v1390_v16  ;;  %1761 = vmatprep.subr.bf16.mxu1 %v3688_v15  ;;  %v3736_v15 = vld [vmem:[#allocation8 + $0xc] ss:$16 sps:$4 sm:$0xff]   ;;  %v3739_v16 = vld [vmem:[#allocation8 + $0x24] ss:$16 sps:$4 sm:$0xff]  }
 0x448   : > { %v3742_v17 = vld [vmem:[#allocation8 + $0x2c] ss:$16 sps:$4 sm:$0xff]  }
 0x449   : > { %3409 = vmatmul.mubr.msk.bf16.vlgmr.msra.gmra.mrb[8].mxu0 %vm1370_vm1, %v1393_v18  ;;  %v3737_v18 = vld [vmem:[#allocation8 + $0x20] ss:$16 sps:$4 sm:$0xff]  }
 0x44a   : > { %1762 = vmatpush1.bf16.msra.mxu1 %v3686_v19  ;;  %2296 = vmatpush1.bf16.msra.mxu0 %v3731_v12  ;;  %v3740_v19 = vld [vmem:[#allocation8 + $0x28] ss:$16 sps:$4 sm:$0xff]   ;;  %v3799_v12 = vld [vmem:[#allocation8 + $0x164] ss:$16 sps:$4 sm:$0xff]  }
 0x44b   : > { %1763 = vmatprep.subr.bf16.mxu1 %v3691_v20  ;;  %2297 = vmatprep.subr.bf16.mxu0 %v3739_v16  ;;  %v3745_v20 = vld [vmem:[#allocation8 + $0x44] ss:$16 sps:$4 sm:$0xff]   ;;  %v3808_v16 = vld [vmem:[#allocation8 + $0x18c] ss:$16 sps:$4 sm:$0xff]  }
 0x44e   : > { %1764 = vmatpush1.bf16.msra.mxu1 %v3689_v21  ;;  %v3748_v21 = vld [vmem:[#allocation8 + $0x4c] ss:$16 sps:$4 sm:$0xff]   ;;  %2298 = vmatpush1.bf16.msra.mxu0 %v3737_v18  ;;  %v3806_v18 = vld [vmem:[#allocation8 + $0x188] ss:$16 sps:$4 sm:$0xff]  }
 0x44f   : > { %1765 = vmatprep.subr.bf16.mxu1 %v3694_v22  ;;  %v3743_v22 = vld [vmem:[#allocation8 + $0x40] ss:$16 sps:$4 sm:$0xff]   ;;  %2299 = vmatprep.subr.bf16.mxu0 %v3745_v20  ;;  %v3814_v20 = vld [vmem:[#allocation8 + $0x1ac] ss:$16 sps:$4 sm:$0xff]  }
 0x452   : > { %1766 = vmatpush1.bf16.msra.mxu1 %v3692_v23  ;;  %v3746_v23 = vld [vmem:[#allocation8 + $0x48] ss:$16 sps:$4 sm:$0xff]   ;;  %2300 = vmatpush1.bf16.msra.mxu0 %v3743_v22 }
 0x453   : > { %1767 = vmatprep.subr.bf16.mxu1 %v3697_v24  ;;  %v3751_v24 = vld [vmem:[#allocation8 + $0x64] ss:$16 sps:$4 sm:$0xff]   ;;  %v3812_v22 = vld [vmem:[#allocation8 + $0x1a8] ss:$16 sps:$4 sm:$0xff]  }
 0x454   : > { %2301 = vmatprep.subr.bf16.mxu0 %v3751_v24  ;;  %v3820_v24 = vld [vmem:[#allocation8 + $0x1cc] ss:$16 sps:$4 sm:$0xff]  }
 0x456   : > { %1768 = vmatpush1.bf16.msra.mxu1 %v3695_v25  ;;  %v3754_v25 = vld [vmem:[#allocation8 + $0x6c] ss:$16 sps:$4 sm:$0xff]  }
 0x457   : > { %1769 = vmatprep.subr.bf16.mxu1 %v3700_v26  ;;  %v3749_v26 = vld [vmem:[#allocation8 + $0x60] ss:$16 sps:$4 sm:$0xff]  }
 0x458   : > { %2302 = vmatpush1.bf16.msra.mxu0 %v3749_v26  ;;  %v3818_v26 = vld [vmem:[#allocation8 + $0x1c8] ss:$16 sps:$4 sm:$0xff]  }
 0x45a   : > { %1770 = vmatpush1.bf16.msra.mxu1 %v3698_v27  ;;  %v3752_v27 = vld [vmem:[#allocation8 + $0x68] ss:$16 sps:$4 sm:$0xff]  }
 0x45b   : > { %1771 = vmatprep.subr.bf16.mxu1 %v3703_v28  ;;  %v3757_v28 = vld [vmem:[#allocation8 + $0x84] ss:$16 sps:$4 sm:$0xff]  }
 0x45c   : > { %2303 = vmatprep.subr.bf16.mxu0 %v3757_v28  ;;  %v3826_v28 = vld [vmem:[#allocation8 + $0x1ec] ss:$16 sps:$4 sm:$0xff]  }
 0x45e   : > { %1772 = vmatpush1.bf16.msra.mxu1 %v3701_v29  ;;  %v3760_v29 = vld [vmem:[#allocation8 + $0x8c] ss:$16 sps:$4 sm:$0xff]  }
 0x45f   : > { %1773 = vmatprep.subr.bf16.mxu1 %v3706_v30  ;;  %v3755_v30 = vld [vmem:[#allocation8 + $0x80] ss:$16 sps:$4 sm:$0xff]  }
 0x460   : > { %2304 = vmatpush1.bf16.msra.mxu0 %v3755_v30  ;;  %v3824_v30 = vld [vmem:[#allocation8 + $0x1e8] ss:$16 sps:$4 sm:$0xff]  }
 0x462   : > { %1774 = vmatpush1.bf16.msra.mxu1 %v3704_v31  ;;  %v3758_v31 = vld [vmem:[#allocation8 + $0x88] ss:$16 sps:$4 sm:$0xff]  }
 0x463   : > { %1775 = vmatprep.subr.bf16.mxu1 %v3709_v32  ;;  %v3763_v32 = vld [vmem:[#allocation8 + $0xa4] ss:$16 sps:$4 sm:$0xff]  }
 0x464   : > { %2305 = vmatprep.subr.bf16.mxu0 %v3763_v32 }
 0x466   : > { %1776 = vmatpush1.bf16.msra.mxu1 %v3707_v33  ;;  %v3766_v33 = vld [vmem:[#allocation8 + $0xac] ss:$16 sps:$4 sm:$0xff]  }
 0x467   : > { %1777 = vmatprep.subr.bf16.mxu1 %v3712_v34  ;;  %v3761_v34 = vld [vmem:[#allocation8 + $0xa0] ss:$16 sps:$4 sm:$0xff]  }
 0x468   : > { %2306 = vmatpush1.bf16.msra.mxu0 %v3761_v34 }
 0x46a   : > { %1778 = vmatpush1.bf16.msra.mxu1 %v3710_v35  ;;  %v3764_v35 = vld [vmem:[#allocation8 + $0xa8] ss:$16 sps:$4 sm:$0xff]  }
 0x46b   : > { %1779 = vmatprep.subr.bf16.mxu1 %v3715_v36 }
 0x46e   : > { %1780 = vmatpush1.bf16.msra.mxu1 %v3713_v37 }
 0x46f   : > { %1781 = vmatprep.subr.bf16.mxu1 %v3718_v38 }
 0x472   : > { %1782 = vmatpush1.bf16.msra.mxu1 %v3716_v40 }
 0x473   : > { %1783 = vmatprep.subr.bf16.mxu1 %v3721_v43 }
 0x476   : > { %1784 = vmatpush1.bf16.msra.mxu1 %v3719_v44 }
 0x477   : > { %1785 = vmatprep.subr.bf16.mxu1 %v3724_v45 }
 0x47a   : > { %1786 = vmatpush1.bf16.msra.mxu1 %v3722_v46 }
 0x47b   : > { %1787 = vmatprep.subr.bf16.mxu1 %v3727_v47 }
 0x47e   : > { %1788 = vmatpush1.bf16.msra.mxu1 %v3725_v48 }
 0x47f   : > { %1789 = vmatprep.subr.bf16.mxu1 %v3730_v49 }
 0x482   : > { %1790 = vmatpush1.bf16.msra.mxu1 %v3728_v50 }
 0x483   : > { %2338 = vmatprep.subr.bf16.mxu1 %v3736_v15  ;;  %v3805_v15 = vld [vmem:[#allocation8 + $0x184] ss:$16 sps:$4 sm:$0xff]  }
 0x518   : > { %v1546_v51 = vpop.f32.mrb[12].mxu1 }
 0x519   : > { %v3422_v52 = vpop.f32.mrb[13].mxu1 }
 0x51a   : > { %v1549_v53 = vpop.f32.mrb[14].mxu1 }
 0x51b   : > { %v1554_v54 = vpack.c.bf16 %v1549_v53, %v1546_v51  ;;  %v3423_v55 = vpop.f32.mrb[15].mxu1  ;;  %v3769_v53 = vld [vmem:[#allocation8 + $0xc4] ss:$16 sps:$4 sm:$0xff]  }
 0x51c   : > { %v1431_v58 = vpop.f32.mrb[8].mxu0  ;;  %v3767_v55 = vld [vmem:[#allocation8 + $0xc0] ss:$16 sps:$4 sm:$0xff]   ;;  %2307 = vmatprep.subr.bf16.mxu0 %v3769_v53 }
 0x51d   : > { %v3410_v59 = vpop.f32.mrb[9].mxu0  ;;  %1791 = vmatprep.mubr.bf16.mxu1 %v1554_v54  ;;  %v3772_v54 = vld [vmem:[#allocation8 + $0xcc] ss:$16 sps:$4 sm:$0xff]   ;;  %2308 = vmatpush1.bf16.msra.mxu0 %v3767_v55  ;;  %v1802_v55 = vld [vmem:[%s4786_s18] sm:$0x3]  ;;  %s3391_s18 = sshll.u32 %s4322_s19, 9 }
 0x51e   : > { %v1434_v60 = vpop.f32.mrb[10].mxu0  ;;  %v3775_v59 = vld [vmem:[#allocation8 + $0xe4] ss:$16 sps:$4 sm:$0xff]   ;;  %s2964_s19 = scalar_lea.sflag [#allocation4], %s4534_s6 }
 0x51f   : > { %v1553_v61 = vpack.c.bf16 %v1434_v60, %v1431_v58  ;;  %v3411_v62 = vpop.f32.mrb[11].mxu0  ;;  %v3770_v58 = vld [vmem:[#allocation8 + $0xc8] ss:$16 sps:$4 sm:$0xff]   ;;  %v3778_v60 = vld [vmem:[#allocation8 + $0xec] ss:$16 sps:$4 sm:$0xff]   ;;  %2309 = vmatprep.subr.bf16.mxu0 %v3775_v59  ;;  %v1857_v59 = vrot.slane %v1802_v55, %v4578_v39 }
 0x520   : > { %v3776_v62 = vld [vmem:[#allocation8 + $0xe8] ss:$16 sps:$4 sm:$0xff]  }
 0x521   : > { %1792 = vmatmul.mubr.bf16.vlgmr.msra.gmra.mrb[16].mxu1 %v1553_v61  ;;  %v3773_v61 = vld [vmem:[#allocation8 + $0xe0] ss:$16 sps:$4 sm:$0xff]  }
 0x522   : > { %2339 = vmatpush1.bf16.msra.mxu1 %v3734_v14  ;;  %2310 = vmatpush1.bf16.msra.mxu0 %v3773_v61  ;;  %v3802_v14 = vld [vmem:[#allocation8 + $0x16c] ss:$16 sps:$4 sm:$0xff]  }
 0x523   : > { %2340 = vmatprep.subr.bf16.mxu1 %v3742_v17  ;;  %2311 = vmatprep.subr.bf16.mxu0 %v3781_v63  ;;  %v3803_v17 = vld [vmem:[#allocation8 + $0x180] ss:$16 sps:$4 sm:$0xff]  }
 0x526   : > { %2341 = vmatpush1.bf16.msra.mxu1 %v3740_v19  ;;  %v3811_v19 = vld [vmem:[#allocation8 + $0x1a4] ss:$16 sps:$4 sm:$0xff]  }
 0x527   : > { %2342 = vmatprep.subr.bf16.mxu1 %v3748_v21  ;;  %v3809_v21 = vld [vmem:[#allocation8 + $0x1a0] ss:$16 sps:$4 sm:$0xff]  }
 0x52a   : > { %2343 = vmatpush1.bf16.msra.mxu1 %v3746_v23  ;;  %v3817_v23 = vld [vmem:[#allocation8 + $0x1c4] ss:$16 sps:$4 sm:$0xff]  }
 0x52b   : > { %2344 = vmatprep.subr.bf16.mxu1 %v3754_v25  ;;  %v3815_v25 = vld [vmem:[#allocation8 + $0x1c0] ss:$16 sps:$4 sm:$0xff]  }
 0x52e   : > { %2345 = vmatpush1.bf16.msra.mxu1 %v3752_v27  ;;  %v3823_v27 = vld [vmem:[#allocation8 + $0x1e4] ss:$16 sps:$4 sm:$0xff]  }
 0x52f   : > { %2346 = vmatprep.subr.bf16.mxu1 %v3760_v29  ;;  %v3821_v29 = vld [vmem:[#allocation8 + $0x1e0] ss:$16 sps:$4 sm:$0xff]  }
 0x532   : > { %2347 = vmatpush1.bf16.msra.mxu1 %v3758_v31  ;;  %v3829_v31 = vld [vmem:[#allocation10 + $0x4] ss:$8 sps:$4 sm:$0xff]  }
 0x533   : > { %2348 = vmatprep.subr.bf16.mxu1 %v3766_v33 }
 0x536   : > { %2349 = vmatpush1.bf16.msra.mxu1 %v3764_v35 }
 0x537   : > { %2350 = vmatprep.subr.bf16.mxu1 %v3772_v54 }
 0x53a   : > { %2351 = vmatpush1.bf16.msra.mxu1 %v3770_v58  ;;  %v1853_v58 = vrot.slane %v1802_v55, %v4572_v42  ;;  %v3874_v55 = vld [vmem:[#allocation10 + $0xf4] ss:$8 sps:$4 sm:$0xff]  }
 0x53b   : > { %2352 = vmatprep.subr.bf16.mxu1 %v3778_v60  ;;  %v1803_v60 = vld [vmem:[%s4787_s7] sm:$0x3] }
 0x53e   : > { %2353 = vmatpush1.bf16.msra.mxu1 %v3776_v62 }
 0x5f4   : > { %v1793_v2 = vpop.f32.mrb[16].mxu1 }
 0x5f5   : > { %v1794_v3 = vadd.f32 %v1793_v2, %v1592_v0  ;;  %v1795_v4 = vpop.f32.mrb[17].mxu1  ;;  %v3782_v2 = vld [vmem:[#allocation8 + $0x108] ss:$16 sps:$4 sm:$0xff]  }
 0x5f6   : > { %v1796_v5 = vadd.f32 %v1795_v4, %v1596_v1  ;;  %v1797_v6 = vpop.f32.mrb[18].mxu1  ;;  %v3790_v4 = vld [vmem:[#allocation8 + $0x12c] ss:$16 sps:$4 sm:$0xff]  }
 0x5f7   : > { %v1798_v7 = vadd.f32 %v1797_v6, %v1592_v0  ;;  %v1799_v8 = vpop.f32.mrb[19].mxu1  ;;  %v3784_v0 = vld [vmem:[#allocation8 + $0x10c] ss:$16 sps:$4 sm:$0xff]   ;;  %v3788_v6 = vld [vmem:[#allocation8 + $0x128] ss:$16 sps:$4 sm:$0xff]  }
 0x5f8   : > { %v1800_v9 = vadd.f32 %v1799_v8, %v1596_v1  ;;  %v1804_v10 = vadd.f32 %v1796_v5, %v1794_v3  ;;  %v3779_v1 = vld [vmem:[#allocation8 + $0x100] ss:$16 sps:$4 sm:$0xff]   ;;  %2354 = vmatprep.subr.bf16.mxu1 %v3784_v0  ;;  %v3796_v8 = vld [vmem:[#allocation8 + $0x14c] ss:$16 sps:$4 sm:$0xff]   ;;  %v1872_v0 = vrot.slane %v1803_v60, %v4572_v42 }
 0x5f9   : > { %2312 = vmatpush1.bf16.msra.mxu0 %v3779_v1  ;;  %2355 = vmatpush1.bf16.msra.mxu1 %v3782_v2  ;;  %v1876_v1 = vrot.slane %v1803_v60, %v4578_v39  ;;  %v1953_v60 = vld [vmem:[%s4788_s14] sm:$0xf]  ;;  %s4690_s14 = scalar_lea.hbm %s4791_s28, %s3391_s18 }
 0x5fa   : > { %1805 = vadd.xlane.f32.xlu0 %v1804_v10  ;;  %v1807_v11 = vadd.f32 %v1800_v9, %v1798_v7  ;;  %2356 = vmatprep.subr.bf16.mxu1 %v3790_v4  ;;  %v3794_v10 = vld [vmem:[#allocation8 + $0x148] ss:$16 sps:$4 sm:$0xff]  }
 0x5fc   : > { %1808 = vadd.xlane.f32.xlu1 %v1807_v11  ;;  %v3797_v11 = vld [vmem:[#allocation8 + $0x160] ss:$16 sps:$4 sm:$0xff]  }
 0x5fd   : > { %2357 = vmatpush1.bf16.msra.mxu1 %v3788_v6 }
 0x5fe   : > { %2358 = vmatprep.subr.bf16.mxu1 %v3796_v8 }
 0x601   : > { %2359 = vmatpush1.bf16.msra.mxu1 %v3794_v10 }
 0x602   : > { %2360 = vmatprep.subr.bf16.mxu1 %v3802_v14 }
 0x605   : > { %2361 = vmatpush1.bf16.msra.mxu1 %v3800_v13  ;;  %v3955_v13 = vld [vmem:[%s4540_s22 + $0x8] sm:$0xff] }
 0x606   : > { %2362 = vmatprep.subr.bf16.mxu1 %v3808_v16 }
 0x609   : > { %2363 = vmatpush1.bf16.msra.mxu1 %v3806_v18 }
 0x60a   : > { %2364 = vmatprep.subr.bf16.mxu1 %v3814_v20  ;;  %v3832_v20 = vld [vmem:[#allocation10 + $0x14] ss:$8 sps:$4 sm:$0xff]  }
 0x60d   : > { %2365 = vmatpush1.bf16.msra.mxu1 %v3812_v22  ;;  %v3835_v22 = vld [vmem:[#allocation10 + $0x24] ss:$8 sps:$4 sm:$0xff]  }
 0x60e   : > { %2366 = vmatprep.subr.bf16.mxu1 %v3820_v24  ;;  %v3838_v24 = vld [vmem:[#allocation10 + $0x34] ss:$8 sps:$4 sm:$0xff]  }
 0x611   : > { %2367 = vmatpush1.bf16.msra.mxu1 %v3818_v26  ;;  %v3841_v26 = vld [vmem:[#allocation10 + $0x44] ss:$8 sps:$4 sm:$0xff]  }
 0x612   : > { %2368 = vmatprep.subr.bf16.mxu1 %v3826_v28  ;;  %v3844_v28 = vld [vmem:[#allocation10 + $0x54] ss:$8 sps:$4 sm:$0xff]  }
 0x615   : > { %2369 = vmatpush1.bf16.msra.mxu1 %v3824_v30  ;;  %v3847_v30 = vld [vmem:[#allocation10 + $0x64] ss:$8 sps:$4 sm:$0xff]  }
 0x687   : > { %v1806_v36 = vpop.xlane.xlu0 %1805 }
 0x688   : > { %v1811_v37 = vmul.f32 0.00390625, %v1806_v36 }
 0x689   : > { %v1809_v38 = vpop.xlane.xlu1 %1808 }
 0x68a   : > { %v4612_v40 = vsub.f32 %v1794_v3, %v1811_v37  ;;  %v4614_v43 = vsub.f32 %v1796_v5, %v1811_v37  ;;  %v1812_v44 = vmul.f32 0.00390625, %v1809_v38  ;;  %v3787_v3 = vld [vmem:[#allocation8 + $0x124] ss:$16 sps:$4 sm:$0xff]   ;;  %v3785_v5 = vld [vmem:[#allocation8 + $0x120] ss:$16 sps:$4 sm:$0xff]  }
 0x68b   : > { %2313 = vmatprep.subr.bf16.mxu0 %v3787_v3 }
 0x68c   : > { %v4616_v45 = vsub.f32 %v1798_v7, %v1812_v44  ;;  %v4618_v46 = vsub.f32 %v1800_v9, %v1812_v44  ;;  %v1817_v47 = vmul.f32 %v4612_v40, %v4612_v40  ;;  %v1818_v48 = vmul.f32 %v4614_v43, %v4614_v43  ;;  %2314 = vmatpush1.bf16.msra.mxu0 %v3785_v5  ;;  %v3793_v7 = vld [vmem:[#allocation8 + $0x144] ss:$16 sps:$4 sm:$0xff]   ;;  %v3791_v9 = vld [vmem:[#allocation8 + $0x140] ss:$16 sps:$4 sm:$0xff]  }
 0x68d   : > { %2315 = vmatprep.subr.bf16.mxu0 %v3793_v7 }
 0x68e   : > { %v1821_v49 = vadd.f32 %v1818_v48, %v1817_v47  ;;  %v1819_v50 = vmul.f32 %v4616_v45, %v4616_v45  ;;  %v1820_v51 = vmul.f32 %v4618_v46, %v4618_v46 }
 0x690   : > { %1822 = vadd.xlane.f32.xlu0 %v1821_v49  ;;  %v1824_v52 = vadd.f32 %v1820_v51, %v1819_v50  ;;  %2316 = vmatpush1.bf16.msra.mxu0 %v3791_v9 }
 0x691   : > { %2317 = vmatprep.subr.bf16.mxu0 %v3799_v12 }
 0x692   : > { %1825 = vadd.xlane.f32.xlu1 %v1824_v52 }
 0x694   : > { %2318 = vmatpush1.bf16.msra.mxu0 %v3797_v11 }
 0x695   : > { %2319 = vmatprep.subr.bf16.mxu0 %v3805_v15  ;;  %v3956_v15 = vld [vmem:[%s4540_s22 + $0x18] sm:$0xff] }
 0x698   : > { %2320 = vmatpush1.bf16.msra.mxu0 %v3803_v17 }
 0x699   : > { %2321 = vmatprep.subr.bf16.mxu0 %v3811_v19  ;;  %v3827_v19 = vld [vmem:[#allocation10] ss:$8 sps:$4 sm:$0xff]  }
 0x69c   : > { %2322 = vmatpush1.bf16.msra.mxu0 %v3809_v21  ;;  %v3830_v21 = vld [vmem:[#allocation10 + $0x10] ss:$8 sps:$4 sm:$0xff]  }
 0x69d   : > { %2323 = vmatprep.subr.bf16.mxu0 %v3817_v23  ;;  %v3833_v23 = vld [vmem:[#allocation10 + $0x20] ss:$8 sps:$4 sm:$0xff]  }
 0x6a0   : > { %2324 = vmatpush1.bf16.msra.mxu0 %v3815_v25  ;;  %v3836_v25 = vld [vmem:[#allocation10 + $0x30] ss:$8 sps:$4 sm:$0xff]  }
 0x6a1   : > { %2325 = vmatprep.subr.bf16.mxu0 %v3823_v27  ;;  %v3839_v27 = vld [vmem:[#allocation10 + $0x40] ss:$8 sps:$4 sm:$0xff]  }
 0x6a4   : > { %2326 = vmatpush1.bf16.msra.mxu0 %v3821_v29  ;;  %v3842_v29 = vld [vmem:[#allocation10 + $0x50] ss:$8 sps:$4 sm:$0xff]  }
 0x6a5   : > { %2789 = vmatprep.subr.bf16.mxu0 %v3829_v31  ;;  %v3845_v31 = vld [vmem:[#allocation10 + $0x60] ss:$8 sps:$4 sm:$0xff]  }
 0x71d   : > { %v1823_v32 = vpop.xlane.xlu0 %1822 }
 0x71e   : > { %v1827_v33 = vmul.f32 0.003921569, %v1823_v32  ;;  %v3850_v32 = vld [vmem:[#allocation10 + $0x74] ss:$8 sps:$4 sm:$0xff]  }
 0x71f   : > { %v1826_v34 = vpop.xlane.xlu1 %1825 }
 0x720   : > { %3939 = vrsqrt.f32 %v1827_v33  ;;  %v1828_v35 = vmul.f32 0.003921569, %v1826_v34  ;;  %vm1831_vm2 = vcmp.eq.f32.partialorder %v1827_v33, inf  ;;  %v1834_v38 = vand.u32 2147483648, %v1827_v33  ;;  %v3853_v34 = vld [vmem:[#allocation10 + $0x84] ss:$8 sps:$4 sm:$0xff]  }
 0x721   : > { %vm1833_vm3 = vcmp.eq.f32.partialorder %v1827_v33, 0.0 }
 0x722   : > { %3941 = vrsqrt.f32 %v1828_v35  ;;  %vm1838_vm4 = vcmp.eq.f32.partialorder %v1828_v35, inf  ;;  %v1841_v51 = vand.u32 2147483648, %v1828_v35  ;;  %vm1840_vm5 = vcmp.eq.f32.partialorder %v1828_v35, 0.0 }
 0x72a   : > { %v3940_v36 = vpop.eup %3939 }
 0x72b   : > { %v1830_v37 = vmul.f32 %v3940_v36, %v1827_v33  ;;  %v3856_v36 = vld [vmem:[#allocation10 + $0x94] ss:$8 sps:$4 sm:$0xff]  }
 0x72c   : > { %v3942_v44 = vpop.eup %3941 }
 0x72d   : > { %v1832_v47 = vsel %vm1831_vm2, %v1827_v33, %v1830_v37  ;;  %v1837_v49 = vmul.f32 %v3942_v44, %v1828_v35  ;;  %v3848_v33 = vld [vmem:[#allocation10 + $0x70] ss:$8 sps:$4 sm:$0xff]   ;;  %v3857_v44 = vld [vmem:[#allocation10 + $0xa0] ss:$8 sps:$4 sm:$0xff]  }
 0x72e   : > { %v1835_v48 = vsel %vm1833_vm3, %v1834_v38, %v1832_v47  ;;  %v3854_v37 = vld [vmem:[#allocation10 + $0x90] ss:$8 sps:$4 sm:$0xff]   ;;  %v3859_v38 = vld [vmem:[#allocation10 + $0xa4] ss:$8 sps:$4 sm:$0xff]   ;;  %v3862_v47 = vld [vmem:[#allocation10 + $0xb4] ss:$8 sps:$4 sm:$0xff]  }
 0x72f   : > { %v1843_v50 = vadd.f32 1e-06, %v1835_v48  ;;  %v1839_v52 = vsel %vm1838_vm4, %v1828_v35, %v1837_v49  ;;  %v3851_v35 = vld [vmem:[#allocation10 + $0x80] ss:$8 sps:$4 sm:$0xff]   ;;  %v3860_v48 = vld [vmem:[#allocation10 + $0xb0] ss:$8 sps:$4 sm:$0xff]  }
 0x730   : > { %v1842_v53 = vsel %vm1840_vm5, %v1841_v51, %v1839_v52  ;;  %v3865_v49 = vld [vmem:[#allocation10 + $0xc4] ss:$8 sps:$4 sm:$0xff]   ;;  %v3868_v51 = vld [vmem:[#allocation10 + $0xd4] ss:$8 sps:$4 sm:$0xff]   ;;  %v3866_v52 = vld [vmem:[#allocation10 + $0xd0] ss:$8 sps:$4 sm:$0xff]  }
 0x731   : > { %3943 = vrcp.f32 %v1843_v50  ;;  %v1844_v54 = vadd.f32 1e-06, %v1842_v53  ;;  %v3863_v50 = vld [vmem:[#allocation10 + $0xc0] ss:$8 sps:$4 sm:$0xff]   ;;  %v3871_v53 = vld [vmem:[#allocation10 + $0xe4] ss:$8 sps:$4 sm:$0xff]  }
 0x733   : > { %3945 = vrcp.f32 %v1844_v54  ;;  %v3869_v54 = vld [vmem:[#allocation10 + $0xe0] ss:$8 sps:$4 sm:$0xff]  }
 0x73b   : > { %v3944_v61 = vpop.eup %3943 }
 0x73c   : > { %v1861_v62 = vmul.f32 %v3944_v61, %v1857_v59  ;;  %v1860_v63 = vmul.f32 %v3944_v61, %v1853_v58  ;;  %v1958_v61 = vrot.slane %v1953_v60, %v4572_v42 }
 0x73d   : > { %v3946_v2 = vpop.eup %3945 }
 0x73e   : > { %v1865_v3 = vmul.f32 %v1861_v62, %v4614_v43  ;;  %v1864_v4 = vmul.f32 %v1860_v63, %v4612_v40  ;;  %v1863_v5 = vmul.f32 %v3946_v2, %v1857_v59  ;;  %v1862_v6 = vmul.f32 %v3946_v2, %v1853_v58  ;;  %v3957_v43 = vld [vmem:[%s4540_s22] sm:$0xff]  ;;  %v3958_v40 = vld [vmem:[%s4540_s22 + $0x10] sm:$0xff] }
 0x73f   : > { %v3872_v58 = vld [vmem:[#allocation10 + $0xf0] ss:$8 sps:$4 sm:$0xff]   ;;  %v3877_v59 = vld [vmem:[#allocation10 + $0x104] ss:$8 sps:$4 sm:$0xff]   ;;  %v1966_v62 = vrot.slane %v1953_v60, %v687_v56  ;;  %v1962_v63 = vrot.slane %v1953_v60, %v4578_v39 }
 0x740   : > { %v1867_v7 = vmul.f32 %v1863_v5, %v4618_v46  ;;  %v1880_v8 = vadd.f32 %v1876_v1, %v1865_v3  ;;  %v1866_v9 = vmul.f32 %v1862_v6, %v4616_v45  ;;  %v1879_v10 = vadd.f32 %v1872_v0, %v1864_v4 }
 0x742   : > { %v1882_v11 = vadd.f32 %v1876_v1, %v1867_v7  ;;  %v1881_v12 = vadd.f32 %v1872_v0, %v1866_v9  ;;  %v4643_v14 = vadd.f32 %v3955_v13, %v1880_v8  ;;  %v4649_v17 = vadd.f32 %v3957_v43, %v1879_v10 }
 0x743   : > { %v1970_v0 = vrot.slane %v1953_v60, %v691_v57  ;;  %v3916_v60 = vld [vmem:[#allocation10 + $0x1d4] ss:$8 sps:$4 sm:$0xff]  }
 0x744   : > { %v4646_v16 = vadd.f32 %v3956_v15, %v1882_v11  ;;  %v4652_v18 = vadd.f32 %v3958_v40, %v1881_v12 }
 0x746   : > { %v1888_v46 = vpack.c.bf16 %v4646_v16, %v4643_v14  ;;  %v1887_v45 = vpack.c.bf16 %v4652_v18, %v4649_v17 }
 0x748   : > { %2327 = vmatprep.mubr.bf16.mxu0 %v1888_v46  ;;  %2370 = vmatprep.mubr.bf16.mxu1 %v1888_v46 }
 0x749   : > { %2328 = vmatmul.mubr.bf16.vlgmr.msra.gmra.mrb[12].mxu0 %v1887_v45  ;;  %2371 = vmatmul.mubr.bf16.vlgmr.msra.gmra.mrb[20].mxu1 %v1887_v45 }
 0x74a   : > { %2790 = vmatpush1.bf16.msra.mxu0 %v3827_v19 }
 0x74b   : > { %2791 = vmatprep.subr.bf16.mxu0 %v3832_v20 }
 0x74e   : > { %2792 = vmatpush1.bf16.msra.mxu0 %v3830_v21 }
 0x74f   : > { %2793 = vmatprep.subr.bf16.mxu0 %v3835_v22 }
 0x752   : > { %2794 = vmatpush1.bf16.msra.mxu0 %v3833_v23 }
 0x753   : > { %2795 = vmatprep.subr.bf16.mxu0 %v3838_v24 }
 0x756   : > { %2796 = vmatpush1.bf16.msra.mxu0 %v3836_v25 }
 0x757   : > { %2797 = vmatprep.subr.bf16.mxu0 %v3841_v26  ;;  %v3875_v26 = vld [vmem:[#allocation10 + $0x100] ss:$8 sps:$4 sm:$0xff]  }
 0x75a   : > { %2798 = vmatpush1.bf16.msra.mxu0 %v3839_v27  ;;  %v3880_v27 = vld [vmem:[#allocation10 + $0x114] ss:$8 sps:$4 sm:$0xff]  }
 0x75b   : > { %2799 = vmatprep.subr.bf16.mxu0 %v3844_v28  ;;  %v3878_v28 = vld [vmem:[#allocation10 + $0x110] ss:$8 sps:$4 sm:$0xff]  }
 0x75e   : > { %2800 = vmatpush1.bf16.msra.mxu0 %v3842_v29  ;;  %v3883_v29 = vld [vmem:[#allocation10 + $0x124] ss:$8 sps:$4 sm:$0xff]  }
 0x75f   : > { %2801 = vmatprep.subr.bf16.mxu0 %v3847_v30  ;;  %v3881_v30 = vld [vmem:[#allocation10 + $0x120] ss:$8 sps:$4 sm:$0xff]  }
 0x762   : > { %2802 = vmatpush1.bf16.msra.mxu0 %v3845_v31  ;;  %v3886_v31 = vld [vmem:[#allocation10 + $0x134] ss:$8 sps:$4 sm:$0xff]  }
 0x763   : > { %2803 = vmatprep.subr.bf16.mxu0 %v3850_v32  ;;  %v3884_v32 = vld [vmem:[#allocation10 + $0x130] ss:$8 sps:$4 sm:$0xff]  }
 0x766   : > { %2804 = vmatpush1.bf16.msra.mxu0 %v3848_v33  ;;  %v3889_v33 = vld [vmem:[#allocation10 + $0x144] ss:$8 sps:$4 sm:$0xff]  }
 0x767   : > { %2805 = vmatprep.subr.bf16.mxu0 %v3853_v34  ;;  %v3887_v34 = vld [vmem:[#allocation10 + $0x140] ss:$8 sps:$4 sm:$0xff]  }
 0x76a   : > { %2806 = vmatpush1.bf16.msra.mxu0 %v3851_v35  ;;  %v3892_v35 = vld [vmem:[#allocation10 + $0x154] ss:$8 sps:$4 sm:$0xff]  }
 0x76b   : > { %2807 = vmatprep.subr.bf16.mxu0 %v3856_v36  ;;  %v3890_v36 = vld [vmem:[#allocation10 + $0x150] ss:$8 sps:$4 sm:$0xff]  }
 0x76e   : > { %2808 = vmatpush1.bf16.msra.mxu0 %v3854_v37  ;;  %v3895_v37 = vld [vmem:[#allocation10 + $0x164] ss:$8 sps:$4 sm:$0xff]  }
 0x76f   : > { %2809 = vmatprep.subr.bf16.mxu0 %v3859_v38  ;;  %v3893_v38 = vld [vmem:[#allocation10 + $0x160] ss:$8 sps:$4 sm:$0xff]  }
 0x772   : > { %2810 = vmatpush1.bf16.msra.mxu0 %v3857_v44  ;;  %v3898_v44 = vld [vmem:[#allocation10 + $0x174] ss:$8 sps:$4 sm:$0xff]  }
 0x773   : > { %2811 = vmatprep.subr.bf16.mxu0 %v3862_v47  ;;  %v3896_v47 = vld [vmem:[#allocation10 + $0x170] ss:$8 sps:$4 sm:$0xff]  }
 0x776   : > { %2812 = vmatpush1.bf16.msra.mxu0 %v3860_v48  ;;  %v3901_v48 = vld [vmem:[#allocation10 + $0x184] ss:$8 sps:$4 sm:$0xff]  }
 0x777   : > { %2813 = vmatprep.subr.bf16.mxu0 %v3865_v49  ;;  %v3899_v49 = vld [vmem:[#allocation10 + $0x180] ss:$8 sps:$4 sm:$0xff]  }
 0x77a   : > { %2814 = vmatpush1.bf16.msra.mxu0 %v3863_v50  ;;  %v3904_v50 = vld [vmem:[#allocation10 + $0x194] ss:$8 sps:$4 sm:$0xff]  }
 0x77b   : > { %2815 = vmatprep.subr.bf16.mxu0 %v3868_v51  ;;  %v3902_v51 = vld [vmem:[#allocation10 + $0x190] ss:$8 sps:$4 sm:$0xff]  }
 0x77e   : > { %2816 = vmatpush1.bf16.msra.mxu0 %v3866_v52  ;;  %v3907_v52 = vld [vmem:[#allocation10 + $0x1a4] ss:$8 sps:$4 sm:$0xff]  }
 0x77f   : > { %2817 = vmatprep.subr.bf16.mxu0 %v3871_v53  ;;  %v3905_v53 = vld [vmem:[#allocation10 + $0x1a0] ss:$8 sps:$4 sm:$0xff]  }
 0x782   : > { %2818 = vmatpush1.bf16.msra.mxu0 %v3869_v54  ;;  %v3910_v54 = vld [vmem:[#allocation10 + $0x1b4] ss:$8 sps:$4 sm:$0xff]  }
 0x783   : > { %2819 = vmatprep.subr.bf16.mxu0 %v3874_v55  ;;  %v3908_v55 = vld [vmem:[#allocation10 + $0x1b0] ss:$8 sps:$4 sm:$0xff]  }
 0x786   : > { %2820 = vmatpush1.bf16.msra.mxu0 %v3872_v58  ;;  %v3913_v58 = vld [vmem:[#allocation10 + $0x1c4] ss:$8 sps:$4 sm:$0xff]  }
 0x787   : > { %2832 = vmatprep.subr.bf16.mxu0 %v3877_v59  ;;  %v3911_v59 = vld [vmem:[#allocation10 + $0x1c0] ss:$8 sps:$4 sm:$0xff]  }
 0x81c   : > { %v2329_v1 = vpop.f32.mrb[12].mxu0  ;;  %v2372_v2 = vpop.f32.mrb[20].mxu1 }
 0x81d   : > { %v2330_v3 = vadd.f32 %v2329_v1, %v1958_v61  ;;  %v2373_v4 = vadd.f32 %v2372_v2, %v1966_v62  ;;  %v2331_v5 = vpop.f32.mrb[13].mxu0  ;;  %v2374_v6 = vpop.f32.mrb[21].mxu1  ;;  %v3920_v1 = vld [vmem:[#allocation10 + $0x1f0] ss:$8 sps:$4 sm:$0xff]   ;;  %v2457_v2 = vld [vmem:[#allocation11] sm:$0x3] }
 0x81e   : > { %v2332_v7 = vadd.f32 %v2331_v5, %v1962_v63  ;;  %v2375_v8 = vadd.f32 %v2374_v6, %v1970_v0  ;;  %v2333_v9 = vpop.f32.mrb[14].mxu0  ;;  %v2376_v10 = vpop.f32.mrb[22].mxu1 }
 0x81f   : > { %v2334_v11 = vadd.f32 %v2333_v9, %v1958_v61  ;;  %v2377_v12 = vadd.f32 %v2376_v10, %v1966_v62  ;;  %v2335_v13 = vpop.f32.mrb[15].mxu0  ;;  %v2378_v15 = vpop.f32.mrb[23].mxu1  ;;  %v2381_v40 = vmax.f32 %v2330_v3, 0.0  ;;  %v2383_v46 = vmax.f32 %v2373_v4, 0.0  ;;  %v3914_v61 = vld [vmem:[#allocation10 + $0x1d0] ss:$8 sps:$4 sm:$0xff]  }
 0x820   : > { %v2336_v56 = vadd.f32 %v2335_v13, %v1962_v63  ;;  %v2379_v43 = vadd.f32 %v2378_v15, %v1970_v0  ;;  %v2382_v45 = vmax.f32 %v2332_v7, 0.0  ;;  %v2384_v19 = vmax.f32 %v2375_v8, 0.0  ;;  %v3919_v62 = vld [vmem:[#allocation10 + $0x1e4] ss:$8 sps:$4 sm:$0xff]   ;;  %v3917_v63 = vld [vmem:[#allocation10 + $0x1e0] ss:$8 sps:$4 sm:$0xff]  }
 0x821   : > { %v2385_v41 = vmax.f32 %v2334_v11, 0.0  ;;  %v2387_v57 = vmax.f32 %v2377_v12, 0.0  ;;  %v3922_v0 = vld [vmem:[#allocation10 + $0x1f4] ss:$8 sps:$4 sm:$0xff]   ;;  %v2462_v3 = vrot.slane %v2457_v2, %v4572_v42  ;;  %v2466_v4 = vrot.slane %v2457_v2, %v4578_v39 }
 0x822   : > { %v2386_v20 = vmax.f32 %v2336_v56, 0.0  ;;  %v2388_v21 = vmax.f32 %v2379_v43, 0.0 }
 0x823   : > { %v2389_v22 = vpack.c.bf16 %v2385_v41, %v2381_v40  ;;  %v4667_v23 = vpack.c.bf16 %v2387_v57, %v2383_v46 }
 0x824   : > { %v2390_v24 = vpack.c.bf16 %v2386_v20, %v2382_v45  ;;  %v2392_v25 = vpack.c.bf16 %v2388_v21, %v2384_v19 }
 0x826   : > { %2821 = vmatprep.mubr.bf16.mxu0 %v2390_v24 }
 0x827   : > { %2822 = vmatmul.mubr.bf16.vlgmr.msra.gmra.mrb[16].mxu0 %v2389_v22 }
 0x828   : > { %2833 = vmatpush1.bf16.msra.mxu0 %v3875_v26  ;;  %2864 = vmatprep.mubr.bf16.mxu0 %v2392_v25 }
 0x829   : > { %2834 = vmatprep.subr.bf16.mxu0 %v3880_v27 }
 0x82c   : > { %2835 = vmatpush1.bf16.msra.mxu0 %v3878_v28 }
 0x82d   : > { %2836 = vmatprep.subr.bf16.mxu0 %v3883_v29 }
 0x830   : > { %2837 = vmatpush1.bf16.msra.mxu0 %v3881_v30 }
 0x831   : > { %2838 = vmatprep.subr.bf16.mxu0 %v3886_v31 }
 0x834   : > { %2839 = vmatpush1.bf16.msra.mxu0 %v3884_v32 }
 0x835   : > { %2840 = vmatprep.subr.bf16.mxu0 %v3889_v33 }
 0x838   : > { %2841 = vmatpush1.bf16.msra.mxu0 %v3887_v34 }
 0x839   : > { %2842 = vmatprep.subr.bf16.mxu0 %v3892_v35 }
 0x83c   : > { %2843 = vmatpush1.bf16.msra.mxu0 %v3890_v36 }
 0x83d   : > { %2844 = vmatprep.subr.bf16.mxu0 %v3895_v37 }
 0x840   : > { %2845 = vmatpush1.bf16.msra.mxu0 %v3893_v38 }
 0x841   : > { %2846 = vmatprep.subr.bf16.mxu0 %v3898_v44 }
 0x844   : > { %2847 = vmatpush1.bf16.msra.mxu0 %v3896_v47 }
 0x845   : > { %2848 = vmatprep.subr.bf16.mxu0 %v3901_v48 }
 0x848   : > { %2849 = vmatpush1.bf16.msra.mxu0 %v3899_v49  ;;  %v2875_v49 = vld [vmem:[%s4789_s13] sm:$0x3]  ;;  %s4135_s13 = scalar_lea.vmem %s4134_s10, 1024 }
 0x849   : > { %2850 = vmatprep.subr.bf16.mxu0 %v3904_v50  ;;  %v2925_v50 = vrot.slane %v2875_v49, %v4572_v42  ;;  %p4137_p13 = scmp.lt.s32.totalorder %s4135_s13, %s4129_s12 }
 0x84b   : > { %p4138_p8 = por %p4137_p13, %p4136_p12 }
 0x84c   : > { %2851 = vmatpush1.bf16.msra.mxu0 %v3902_v51  ;;  %v2929_v51 = vrot.slane %v2875_v49, %v4578_v39 }
 0x84d   : > { %2852 = vmatprep.subr.bf16.mxu0 %v3907_v52  ;;  %v2876_v52 = vld [vmem:[%s4790_s21] sm:$0x3]  ;;  %p4139_p6 = pnand %p4138_p8, %p4132_p11 }
 0x850   : > { %2853 = vmatpush1.bf16.msra.mxu0 %v3905_v53 }
 0x851   : > { %2854 = vmatprep.subr.bf16.mxu0 %v3910_v54 }
 0x854   : > { %2855 = vmatpush1.bf16.msra.mxu0 %v3908_v55 }
 0x855   : > { %2856 = vmatprep.subr.bf16.mxu0 %v3913_v58  ;;  %v2944_v58 = vrot.slane %v2876_v52, %v4572_v42 }
 0x858   : > { %2857 = vmatpush1.bf16.msra.mxu0 %v3911_v59  ;;  %v2948_v59 = vrot.slane %v2876_v52, %v4578_v39 }
 0x859   : > { %2858 = vmatprep.subr.bf16.mxu0 %v3916_v60 }
 0x85c   : > { %2859 = vmatpush1.bf16.msra.mxu0 %v3914_v61 }
 0x85d   : > { %2860 = vmatprep.subr.bf16.mxu0 %v3919_v62 }
 0x860   : > { %2861 = vmatpush1.bf16.msra.mxu0 %v3917_v63 }
 0x861   : > { %2862 = vmatprep.subr.bf16.mxu0 %v3922_v0 }
 0x864   : > { %2863 = vmatpush1.bf16.msra.mxu0 %v3920_v1 }
 0x867   : > { %2865 = vmatmul.mubr.bf16.vlgmr.msra.gmra.mrb[16].mxu0 %v4667_v23 }
 0x93a   : > { %v2866_v5 = vpop.f32.mrb[16].mxu0 }
 0x93b   : > { %v3424_v6 = vadd.f32 %v2866_v5, %v2462_v3  ;;  %v2868_v7 = vpop.f32.mrb[17].mxu0 }
 0x93c   : > { %v3425_v8 = vadd.f32 %v2868_v7, %v2466_v4  ;;  %v2870_v9 = vpop.f32.mrb[18].mxu0 }
 0x93d   : > { %v3426_v10 = vadd.f32 %v2870_v9, %v2462_v3  ;;  %v2872_v11 = vpop.f32.mrb[19].mxu0 }
 0x93e   : > { %v3427_v12 = vadd.f32 %v2872_v11, %v2466_v4  ;;  %v2877_v13 = vadd.f32 %v3425_v8, %v3424_v6 }
 0x940   : > { %2878 = vadd.xlane.f32.xlu0 %v2877_v13  ;;  %v2880_v15 = vadd.f32 %v3427_v12, %v3426_v10 }
 0x942   : > { %2881 = vadd.xlane.f32.xlu1 %v2880_v15 }
 0x9cd   : > { %v2879_v56 = vpop.xlane.xlu0 %2878 }
 0x9ce   : > { %v2883_v43 = vmul.f32 0.00390625, %v2879_v56 }
 0x9cf   : > { %v2882_v40 = vpop.xlane.xlu1 %2881 }
 0x9d0   : > { %v2885_v46 = vsub.f32 %v3424_v6, %v2883_v43  ;;  %v2886_v41 = vsub.f32 %v3425_v8, %v2883_v43  ;;  %v2884_v57 = vmul.f32 0.00390625, %v2882_v40 }
 0x9d2   : > { %v2887_v45 = vsub.f32 %v3426_v10, %v2884_v57  ;;  %v2888_v19 = vsub.f32 %v3427_v12, %v2884_v57  ;;  %v2889_v20 = vmul.f32 %v2885_v46, %v2885_v46  ;;  %v2890_v21 = vmul.f32 %v2886_v41, %v2886_v41 }
 0x9d4   : > { %v2893_v22 = vadd.f32 %v2890_v21, %v2889_v20  ;;  %v2891_v23 = vmul.f32 %v2887_v45, %v2887_v45  ;;  %v2892_v24 = vmul.f32 %v2888_v19, %v2888_v19 }
 0x9d6   : > { %2894 = vadd.xlane.f32.xlu0 %v2893_v22  ;;  %v2896_v25 = vadd.f32 %v2892_v24, %v2891_v23 }
 0x9d8   : > { %2897 = vadd.xlane.f32.xlu1 %v2896_v25 }
 0xa63   : > { %v2895_v26 = vpop.xlane.xlu0 %2894 }
 0xa64   : > { %v2899_v27 = vmul.f32 0.003921569, %v2895_v26 }
 0xa65   : > { %v2898_v28 = vpop.xlane.xlu1 %2897 }
 0xa66   : > { %3947 = vrsqrt.f32 %v2899_v27  ;;  %v2900_v29 = vmul.f32 0.003921569, %v2898_v28  ;;  %vm2903_vm6 = vcmp.eq.f32.partialorder %v2899_v27, inf  ;;  %v2906_v32 = vand.u32 2147483648, %v2899_v27 }
 0xa67   : > { %vm2905_vm7 = vcmp.eq.f32.partialorder %v2899_v27, 0.0 }
 0xa68   : > { %3949 = vrsqrt.f32 %v2900_v29  ;;  %vm2910_vm8 = vcmp.eq.f32.partialorder %v2900_v29, inf  ;;  %v2913_v38 = vand.u32 2147483648, %v2900_v29  ;;  %vm2912_vm9 = vcmp.eq.f32.partialorder %v2900_v29, 0.0 }
 0xa70   : > { %v3948_v30 = vpop.eup %3947 }
 0xa71   : > { %v2902_v31 = vmul.f32 %v3948_v30, %v2899_v27 }
 0xa72   : > { %v3950_v33 = vpop.eup %3949 }
 0xa73   : > { %v2904_v34 = vsel %vm2903_vm6, %v2899_v27, %v2902_v31  ;;  %v2909_v36 = vmul.f32 %v3950_v33, %v2900_v29 }
 0xa74   : > { %v2907_v35 = vsel %vm2905_vm7, %v2906_v32, %v2904_v34 }
 0xa75   : > { %v2915_v37 = vadd.f32 1e-06, %v2907_v35  ;;  %v2911_v44 = vsel %vm2910_vm8, %v2900_v29, %v2909_v36 }
 0xa76   : > { %v2914_v47 = vsel %vm2912_vm9, %v2913_v38, %v2911_v44 }
 0xa77   : > { %3951 = vrcp.f32 %v2915_v37  ;;  %v2916_v48 = vadd.f32 1e-06, %v2914_v47 }
 0xa79   : > { %3953 = vrcp.f32 %v2916_v48 }
 0xa81   : > { %v3952_v53 = vpop.eup %3951 }
 0xa82   : > { %v2932_v54 = vmul.f32 %v3952_v53, %v2925_v50  ;;  %v2933_v55 = vmul.f32 %v3952_v53, %v2929_v51 }
 0xa83   : > { %v3954_v60 = vpop.eup %3953 }
 0xa84   : > { %v2936_v61 = vmul.f32 %v2932_v54, %v2885_v46  ;;  %v2937_v62 = vmul.f32 %v2933_v55, %v2886_v41  ;;  %v2934_v63 = vmul.f32 %v3954_v60, %v2925_v50  ;;  %v2935_v0 = vmul.f32 %v3954_v60, %v2929_v51 }
 0xa86   : > { %v2951_v1 = vadd.f32 %v2944_v58, %v2936_v61  ;;  %v2952_v2 = vadd.f32 %v2948_v59, %v2937_v62  ;;  %v2938_v3 = vmul.f32 %v2934_v63, %v2887_v45  ;;  %v2939_v4 = vmul.f32 %v2935_v0, %v2888_v19 }
 0xa88   : > { %v2955_v5 = vadd.f32 %v2951_v1, %v4649_v17  ;;  %v2956_v42 = vadd.f32 %v2952_v2, %v4643_v14  ;;  %v2953_v39 = vadd.f32 %v2944_v58, %v2938_v3  ;;  %v2954_v6 = vadd.f32 %v2948_v59, %v2939_v4 }
 0xa8a   : > { %2959 = vst [vmem:[%s567_s26] sm:$0xff] %v2955_v5  ;;  %2960 = vst [vmem:[%s567_s26 + $0x8] sm:$0xff] %v2956_v42  ;;  %v2957_v7 = vadd.f32 %v2953_v39, %v4652_v18  ;;  %v2958_v17 = vadd.f32 %v2954_v6, %v4646_v16 }
 0xa8c   : > { %2961 = vst [vmem:[%s567_s26 + $0x10] sm:$0xff] %v2957_v7  ;;  %2962 = vst [vmem:[%s567_s26 + $0x18] sm:$0xff] %v2958_v17 }
 0xa8d   : > { %4142 = shalt.err (!%p4139_p6)
}
 0xa8e   : > { %s4143_s24 = scalar_lea.hbm %s4690_s14, 512  ;;  %s4147_s18 = scalar_lea.hbm %s4791_s28, 1024 }
 0xa8f   : > { %p4144_p9 = scmp.ne.s32.totalorder %s4690_s14, %s4143_s24  ;;  %p4148_p0 = scmp.lt.u32.totalorder %s4690_s14, %s4791_s28 }
 0xa90   : > { %p4149_p5 = scmp.lt.u32.totalorder %s4147_s18, %s4143_s24  ;;  %p4151_p7 = scmp.lt.u32.totalorder %s4143_s24, %s4690_s14 }
 0xa91   : > { %p4145_p4 = pnand %p4144_p9, %p4792_p10 }
 0xa92   : > { %p4150_p2 = por %p4149_p5, %p4148_p0 }
 0xa93   : > { %p4146_p3 = pneg %p4145_p4 }
 0xa94   : > { %p4152_p1 = por %p4151_p7, %p4150_p2 }
 0xa96   : > { %p4153_p11 = pnand %p4152_p1, %p4146_p3 }
 0xa98   : > { %4156 = shalt.err (!%p4153_p11)
}
 0xa99   : > { %s4224_s22 = smov 256   ;;  %s4225_s12 = smov 16  }
 0xa9a   : > { %3454 = dma.vmem_to_hbm [thread:$0]  (%p4792_p10), %s4692_s20, 512, %s4690_s14, %s2964_s19, %s4224_s22, %s4224_s22, %s4225_s12  }
 0xa9b PF: > { %s2992_s11 = sand.u32 1, %s4195_s29   ;;  %p4793_p12 = scmp.ne.s32.totalorder %s4775_s2, 0 }
 0xa9c   : > { %p4794_p13 = scmp.ge.s32.totalorder %s4207_s16, 2  ;;  %s2993_s10 = scalar_lea.sflag [#allocation4], %s2992_s11 }
 0xa9e   : > { %p3477_p8 = pnand %p4794_p13, %p4793_p12 }
 0xaa0   : > { %4190 = dma.done.wait (!%p3477_p8), %s2993_s10, 512  }
 0xaa1   : > { %4192 = vsyncadd (!%p3477_p8), %s2993_s10, 4294966784  ;;  %p30_p6 = scmp.ge.s32.totalorder %s4458_s23, 4   ;;  %s4795_s29 = smov %s4199_s30 }
 0xaa2   : > { %s4796_s30 = smov %s4203_s15  ;;  %s4797_s15 = smov %s4470_s25 }
 0xaa3   : > { %s4798_s16 = smov %s4458_s23  ;;  %32 = sbr.rel (!%p30_p6) target bundleno = 17 (0x11), region = 144 }
 0xaaa   :  { %2998 = vsyncpa [#allocation3], 1 }
 0xaab   :  { %3000 = vsyncpa [#allocation3 + $0x1], 1 }
 0xaac   :  { %3001 = vsyncpa [#allocation6], 1 }
 0xaad   :  { %3002 = vsyncpa [#allocation9], 1 }
 0xaae   :  { %3003 = vsyncpa [#allocation12], 1 }
 0xaaf   :  { %3004 = vsyncpa [#allocation4], 1 }
 0xab0   :  { %3006 = vsyncpa [#allocation4 + $0x1], 1 }

</bundles_post_ra>
